<compile_context>
chip_gen: v7x
topology: tpu7x:2x2x1
jax: 0.10.0
libtpu: 0.0.40
codegen_flags: <defaults>
</compile_context>

<pallas_src>
import functools

import jax
import jax.numpy as jnp
from jax import lax
from jax.experimental import pallas as pl
from jax.experimental.pallas import tpu as pltpu

LANE = 128


def _round_up(x, m):
    return ((x + m - 1) // m) * m


# ----------------------------------------------------------------------------- #
# Fused kernel: ChannelWiseLSTM (+FC) -> Graph layer -> BN(eval) -> ReLU.
# One grid step processes TB complete batches, i.e. R = TB * C rows.
# ----------------------------------------------------------------------------- #
def hdgsm_fused_kernel(patches_ref, w_ihc_ref, w_hhc_ref, b_ref, w_fc_ref,
                       b_fc_ref, wg_ref, at_ref, bias_ref, out_ref,
                       xproj_ref, hs_ref):
    """Shapes seen by the kernel (R = TB*C, Hp/Lp padded to multiples of 128):
      patches_ref : (P, R, PS)    bf16  time-major LSTM input patches
      w_ihc_ref   : (PS, 4*Hp)    bf16  fused gate input weights, order [i|f|o|g]
      w_hhc_ref   : (Hp, 4*Hp)    bf16  fused gate recurrent weights
      b_ref       : (1, 4*Hp)     f32   combined b_ih + b_hh (gate-fused)
      w_fc_ref    : (P, Hp, Lp)   bf16  per-timestep slices of the (P*H, L) FC weight
      b_fc_ref    : (1, Lp)       f32
      wg_ref      : (Lp, Lp)      bf16  graph weight Wg
      at_ref      : (R, R)        f32   kron(I_TB, diag(bn_scale) @ At)
      bias_ref    : (R, Lp)       f32   bn_scale*bg + beta - mean*bn_scale (tiled TB)
      out_ref     : (R, Lp)       f32
      xproj_ref   : (P, R, 4*Hp)  f32   scratch: per-timestep gate preactivations
      hs_ref      : (P, R, Hp)    bf16  scratch: hidden-state history (deferred FC)
    """
    P, R, PS = patches_ref.shape
    Hp, G4 = w_hhc_ref.shape
    NS = G4 - Hp                                  # sigmoid slab width (gates i,f,o)
    Lp = out_ref.shape[-1]

    w_hhc = w_hhc_ref[...]                        # hoisted recurrent weights

    # ---- LSTM input projections for ALL timesteps: one fused-gate matmul ----
    xp = patches_ref[...].reshape(P * R, PS)
    xproj = jnp.dot(xp, w_ihc_ref[...], preferred_element_type=jnp.float32)
    xproj_ref[...] = (xproj + b_ref[...]).reshape(P, R, G4)

    # ---- serial recurrence: ONE (R,Hp)@(Hp,4Hp) matmul + 2 nonlinear slabs/step ----
    def step(t, carry):
        h, c = carry
        pre = xproj_ref[t] + jnp.dot(h.astype(w_hhc.dtype), w_hhc,
                                     preferred_element_type=jnp.float32)
        sig = jax.nn.sigmoid(pre[:, :NS])         # [ i | f | o ] contiguous slab
        g_g = jnp.tanh(pre[:, NS:])               # [ g ] slab
        i_g = sig[:, :Hp]
        f_g = sig[:, Hp:2 * Hp]
        o_g = sig[:, 2 * Hp:NS]
        c = f_g * c + i_g * g_g
        h = o_g * jnp.tanh(c)
        hs_ref[t] = h.astype(hs_ref.dtype)        # stash for the deferred FC
        return h, c

    h0 = jnp.zeros((R, Hp), jnp.float32)
    c0 = jnp.zeros((R, Hp), jnp.float32)
    _ = lax.fori_loop(0, P, step, (h0, c0), unroll=True)

    # ---- deferred FC (Linear P*H -> L), off the serial critical path ----
    acc = jnp.zeros((R, Lp), jnp.float32)
    for t in range(P):                            # small static count, post-loop
        acc = acc + jnp.dot(hs_ref[t], w_fc_ref[t],
                            preferred_element_type=jnp.float32)
    time_out = acc + b_fc_ref[...]                # (R, Lp)

    # ---- graph feature extraction + BN(eval) + ReLU, all folded ----
    # (At @ h) @ Wg == At @ (h @ Wg): big lane-dense (R,Lp)@(Lp,Lp) matmul first,
    # then the tiny block-diagonal (BN-scaled) At mix, kept in f32 for accuracy.
    z = jnp.dot(time_out.astype(wg_ref.dtype), wg_ref[...],
                preferred_element_type=jnp.float32)                 # (R, Lp)
    s = jnp.dot(at_ref[...], z, preferred_element_type=jnp.float32)  # (R, Lp)
    # Dropout(0.4) is identity in eval mode.
    out_ref[...] = jnp.maximum(s + bias_ref[...], 0.0)


# ----------------------------------------------------------------------------- #
# Parameters (torch-like layouts; casting/packing/padding happens in the wrapper)
# ----------------------------------------------------------------------------- #
def init_params(key, in_channel, seq_len, hidden_size, patch_size, stride):
    P = (seq_len - patch_size) // stride + 1
    H = hidden_size
    ks = jax.random.split(key, 10)
    s = 0.1
    params = {
        # LSTM, torch gate order (i, f, g, o); single bias stands in for b_ih + b_hh.
        "w_ih": s * jax.random.normal(ks[0], (4, patch_size, H), jnp.float32),
        "w_hh": s * jax.random.normal(ks[1], (4, H, H), jnp.float32),
        "b": s * jax.random.normal(ks[2], (4, 1, H), jnp.float32),
        # Linear (P*H) -> Seq_len, stored as per-timestep (P, H, L) slices.
        "w_fc": s * jax.random.normal(ks[3], (P, H, seq_len), jnp.float32),
        "b_fc": s * jax.random.normal(ks[4], (1, seq_len), jnp.float32),
        # Graph layer.
        "wg": s * jax.random.normal(ks[5], (seq_len, seq_len), jnp.float32),
        "bg": s * jax.random.normal(ks[6], (1, seq_len), jnp.float32),
        "at_learned": jax.nn.softmax(
            jax.random.normal(ks[7], (in_channel, in_channel), jnp.float32), axis=-1),
        # BatchNorm1d (eval mode).
        "gamma": 1.0 + s * jax.random.normal(ks[8], (in_channel,), jnp.float32),
        "beta": s * jax.random.normal(ks[9], (in_channel,), jnp.float32),
        "running_mean": jnp.zeros((in_channel,), jnp.float32),
        "running_var": jnp.ones((in_channel,), jnp.float32),
    }
    return params


# ----------------------------------------------------------------------------- #
# Batch-tile heuristic: fill the MXU M dimension, keep the grid balanced
# ----------------------------------------------------------------------------- #
def _default_r_target():
    # v5e's MXU M tile is 128; v6e/v7x have 256-wide MXUs.
    try:
        kind = jax.devices()[0].device_kind.lower()
        if "v5 lite" in kind or "v5e" in kind or "v5lite" in kind:
            return 128
    except Exception:
        pass
    return 256


def _pick_batch_tile(B, C, r_target):
    def ok(tb):
        return B % tb == 0 and tb * C <= r_target and (tb * C) % 8 == 0
    # Prefer an even number of grid steps (v7x: 2 TensorCores share the grid).
    for tb in range(B, 0, -1):
        if ok(tb) and (B // tb) % 2 == 0:
            return tb
    for tb in range(B, 0, -1):
        if ok(tb):
            return tb
    return B  # single grid step: block == full array, no alignment constraint


# ----------------------------------------------------------------------------- #
# Host-side wrapper
# ----------------------------------------------------------------------------- #
@functools.partial(jax.jit,
                   static_argnames=("patch_size", "stride", "is_random_at",
                                    "batch_tile"))
def hdgsm_forward(x, At, params, *, patch_size, stride, is_random_at=False,
                  batch_tile=None):
    B, C, L = x.shape
    PS = patch_size
    P = (L - patch_size) // stride + 1
    H = params["w_hh"].shape[-1]
    Hp = _round_up(H, LANE)           # per-gate padded hidden width
    Lp = _round_up(L, LANE)           # lane-dense output / graph width

    # ---- batch-tile selection: TB complete batches per grid step ----
    if batch_tile is None:
        batch_tile = _pick_batch_tile(B, C, _default_r_target())
    TB = batch_tile
    assert B % TB == 0, "batch_tile must divide the batch size"
    R = TB * C
    assert R % 8 == 0 or TB == B, "rows per grid step must be sublane aligned"
    G = B // TB

    # ---- patchify: plain reshape when non-overlapping & exact (no gather) ----
    if stride == patch_size and P * patch_size == L:
        patches = x.reshape(B * C, P, PS)
    else:
        # TODO(synk): trailing samples beyond the last full patch are dropped,
        #             matching torch unfold semantics; confirm against reference.
        idx = jnp.arange(P)[:, None] * stride + jnp.arange(PS)[None, :]
        patches = x[:, :, idx].reshape(B * C, P, PS)
    # time-major (P, B*C, PS): each timestep is a contiguous, sublane-aligned block.
    patches = patches.transpose(1, 0, 2).astype(jnp.bfloat16)

    # ---- fused + padded gate weights: order [i | f | o | g], each gate Hp wide ----
    # Padded hidden units get zero weights/bias -> i=f=o=0.5, g=0 -> c,h stay 0.
    order = (0, 1, 3, 2)              # torch order (i,f,g,o) -> (i,f,o,g)

    def _pad_gate_cols(m):            # (..., H) -> (..., Hp)
        return jnp.pad(m, [(0, 0)] * (m.ndim - 1) + [(0, Hp - H)])

    w_ihc = jnp.concatenate([_pad_gate_cols(params["w_ih"][g]) for g in order],
                            axis=-1).astype(jnp.bfloat16)              # (PS, 4Hp)
    w_hhc = jnp.concatenate(
        [jnp.pad(params["w_hh"][g], ((0, Hp - H), (0, Hp - H))) for g in order],
        axis=-1).astype(jnp.bfloat16)                                   # (Hp, 4Hp)
    b_c = jnp.concatenate([_pad_gate_cols(params["b"][g]) for g in order],
                          axis=-1).astype(jnp.float32)                  # (1, 4Hp)

    # ---- padded FC / graph weights ----
    w_fc_p = jnp.pad(params["w_fc"],
                     ((0, 0), (0, Hp - H), (0, Lp - L))).astype(jnp.bfloat16)
    b_fc_p = jnp.pad(params["b_fc"], ((0, 0), (0, Lp - L))).astype(jnp.float32)
    wg_p = jnp.pad(params["wg"], ((0, Lp - L), (0, Lp - L))).astype(jnp.bfloat16)

    # ---- fold BN(eval) + bg + adjacency into kernel constants ----
    at_used = params["at_learned"] if is_random_at else At.astype(jnp.float32)
    a_c = params["gamma"] / jnp.sqrt(params["running_var"] + 1e-5)      # (C,)
    at_scaled = a_c[:, None] * at_used                                   # diag(a_c)@At
    # TODO(synk): for large TB replace the kron block-diagonal mix with a direct
    #             contraction over C to avoid TB x redundant FLOPs.
    at_block = jnp.kron(jnp.eye(TB, dtype=jnp.float32),
                        at_scaled).astype(jnp.float32)                   # (R, R) f32
    bias_cl = (a_c[:, None] * params["bg"]
               + (params["beta"] - params["running_mean"] * a_c)[:, None])   # (C, L)
    bias_rows = jnp.tile(jnp.pad(bias_cl, ((0, 0), (0, Lp - L))),
                         (TB, 1)).astype(jnp.float32)                    # (R, Lp)

    # ---- advisory cost estimate ----
    flops = (2 * B * C * P * PS * 4 * Hp          # fused input projection
             + 2 * B * C * P * Hp * 4 * Hp        # fused recurrent matmul
             + 2 * B * C * P * Hp * Lp            # deferred FC
             + 2 * B * C * Lp * Lp                # h @ Wg
             + 2 * G * R * R * Lp)                # block-diagonal At mix
    transcendentals = 5 * B * C * P * Hp

    def _nbytes(a):
        return a.size * a.dtype.itemsize

    weights_bytes = sum(_nbytes(a) for a in
                        (w_ihc, w_hhc, b_c, w_fc_p, b_fc_p, wg_p, at_block,
                         bias_rows))
    bytes_accessed = int(_nbytes(patches) + B * C * Lp * 4 + weights_bytes)
    cost = pl.CostEstimate(flops=int(flops), transcendentals=int(transcendentals),
                           bytes_accessed=bytes_accessed)

    # ---- explicit VMEM budget (double-buffered blocks + weights + scratch) ----
    # TODO(synk): mark constant-index weight operands single-buffered
    #             (pipeline_mode=pl.Buffered(1)) once verified on the target jax.
    patches_blk = P * R * PS * 2
    out_blk = R * Lp * 4
    scratch_bytes = P * R * 4 * Hp * 4 + P * R * Hp * 2
    working_set = 2 * (patches_blk + out_blk) + 2 * weights_bytes + scratch_bytes
    vmem_limit = int(min(max(2 * working_set, 32 * 1024 * 1024), 64 * 1024 * 1024))

    out2d = pl.pallas_call(
        hdgsm_fused_kernel,
        out_shape=jax.ShapeDtypeStruct((B * C, Lp), jnp.float32),
        grid=(G,),
        in_specs=[
            pl.BlockSpec((P, R, PS), lambda g: (0, g, 0)),     # patches (time-major)
            pl.BlockSpec((PS, 4 * Hp), lambda g: (0, 0)),      # fused w_ih
            pl.BlockSpec((Hp, 4 * Hp), lambda g: (0, 0)),      # fused w_hh
            pl.BlockSpec((1, 4 * Hp), lambda g: (0, 0)),       # fused gate bias
            pl.BlockSpec((P, Hp, Lp), lambda g: (0, 0, 0)),    # w_fc (per timestep)
            pl.BlockSpec((1, Lp), lambda g: (0, 0)),           # b_fc
            pl.BlockSpec((Lp, Lp), lambda g: (0, 0)),          # Wg
            pl.BlockSpec((R, R), lambda g: (0, 0)),            # block-diag scaled At
            pl.BlockSpec((R, Lp), lambda g: (0, 0)),           # folded BN/bg bias
        ],
        out_specs=pl.BlockSpec((R, Lp), lambda g: (g, 0)),
        scratch_shapes=[
            pltpu.VMEM((P, R, 4 * Hp), jnp.float32),           # gate preactivations
            pltpu.VMEM((P, R, Hp), jnp.bfloat16),              # hidden-state history
        ],
        compiler_params=pltpu.CompilerParams(
            dimension_semantics=("parallel",),
            vmem_limit_bytes=vmem_limit),
        cost_estimate=cost,
    )(patches, w_ihc, w_hhc, b_c, w_fc_p, b_fc_p, wg_p, at_block, bias_rows)

    return out2d[:, :L].reshape(B, C, L)


if __name__ == "__main__":
    # Small shapes consistent with the module (stride defaults to patch_size):
    B, C, L = 4, 8, 32          # batch, in_channel, Seq_len
    hidden_size = 8
    patch_size = 8
    stride = 8                  # -> Patch_SeqLen P = 4

    key = jax.random.PRNGKey(0)
    k_x, k_a, k_p = jax.random.split(key, 3)

    x = jax.random.normal(k_x, (B, C, L), jnp.float32)
    At = jax.nn.softmax(jax.random.normal(k_a, (C, C), jnp.float32), axis=-1)
    params = init_params(k_p, C, L, hidden_size, patch_size, stride)

    out = hdgsm_forward(x, At, params, patch_size=patch_size, stride=stride,
                        is_random_at=False)
    out = jax.block_until_ready(out)

    assert out.shape == (B, C, L)
    assert bool(jnp.all(out >= 0.0))          # ReLU output
    assert bool(jnp.all(jnp.isfinite(out)))
    print("KERNEL_OK")
</pallas_src>

<mosaic_0001>
module attributes {stable_mosaic.version = 11 : i64} {
  func.func @hdgsm_fused_kernel(%arg0: i32, %arg1: memref<4x16x8xbf16, #tpu.memory_space<vmem>>, %arg2: memref<8x512xbf16, #tpu.memory_space<vmem>>, %arg3: memref<128x512xbf16, #tpu.memory_space<vmem>>, %arg4: memref<1x512xf32, #tpu.memory_space<vmem>>, %arg5: memref<4x128x128xbf16, #tpu.memory_space<vmem>>, %arg6: memref<1x128xf32, #tpu.memory_space<vmem>>, %arg7: memref<128x128xbf16, #tpu.memory_space<vmem>>, %arg8: memref<16x16xf32, #tpu.memory_space<vmem>>, %arg9: memref<16x128xf32, #tpu.memory_space<vmem>>, %arg10: memref<16x128xf32, #tpu.memory_space<vmem>>, %arg11: memref<4x16x512xf32, #tpu.memory_space<vmem>>, %arg12: memref<4x16x128xbf16, #tpu.memory_space<vmem>>) attributes {dimension_semantics = [#tpu.dimension_semantics<parallel>], iteration_bounds = array<i64: 2>, scalar_prefetch = 0 : i64, scratch_operands = 2 : i64, tpu.core_type = #tpu.core_type<tc>, window_params = [{transform_indices = @transform_0, window_bounds = array<i64: 4, 16, 8>}, {pipeline_mode = #tpu.pipeline_mode<synchronous>, transform_indices = @transform_1, window_bounds = array<i64: 8, 512>}, {pipeline_mode = #tpu.pipeline_mode<synchronous>, transform_indices = @transform_2, window_bounds = array<i64: 128, 512>}, {pipeline_mode = #tpu.pipeline_mode<synchronous>, transform_indices = @transform_3, window_bounds = array<i64: 1, 512>}, {pipeline_mode = #tpu.pipeline_mode<synchronous>, transform_indices = @transform_4, window_bounds = array<i64: 4, 128, 128>}, {pipeline_mode = #tpu.pipeline_mode<synchronous>, transform_indices = @transform_5, window_bounds = array<i64: 1, 128>}, {pipeline_mode = #tpu.pipeline_mode<synchronous>, transform_indices = @transform_6, window_bounds = array<i64: 128, 128>}, {pipeline_mode = #tpu.pipeline_mode<synchronous>, transform_indices = @transform_7, window_bounds = array<i64: 16, 16>}, {pipeline_mode = #tpu.pipeline_mode<synchronous>, transform_indices = @transform_8, window_bounds = array<i64: 16, 128>}, {transform_indices = @transform_9, window_bounds = array<i64: 16, 128>}]} {
    %c0 = arith.constant 0 : index
    %c0_0 = arith.constant 0 : index
    %0 = vector.load %arg3[%c0, %c0_0] : memref<128x512xbf16, #tpu.memory_space<vmem>>, vector<128x512xbf16>
    %c0_1 = arith.constant 0 : index
    %c0_2 = arith.constant 0 : index
    %c0_3 = arith.constant 0 : index
    %1 = vector.load %arg1[%c0_1, %c0_2, %c0_3] : memref<4x16x8xbf16, #tpu.memory_space<vmem>>, vector<4x16x8xbf16>
    %2 = vector.shape_cast %1 : vector<4x16x8xbf16> to vector<64x8xbf16>
    %c0_4 = arith.constant 0 : index
    %c0_5 = arith.constant 0 : index
    %3 = vector.load %arg2[%c0_4, %c0_5] : memref<8x512xbf16, #tpu.memory_space<vmem>>, vector<8x512xbf16>
    %cst = arith.constant dense<0.000000e+00> : vector<64x512xf32>
    %4 = tpu.matmul %2, %3, %cst {dimension_numbers = #tpu.dot_dimension_numbers<[1], [0], [0], [1], [0, 0, 1, 1], [], []>} : vector<64x8xbf16>, vector<8x512xbf16>, vector<64x512xf32> -> vector<64x512xf32>
    %c0_6 = arith.constant 0 : index
    %c0_7 = arith.constant 0 : index
    %5 = vector.load %arg4[%c0_6, %c0_7] : memref<1x512xf32, #tpu.memory_space<vmem>>, vector<1x512xf32>
    %6 = vector.broadcast %5 : vector<1x512xf32> to vector<64x512xf32>
    %7 = arith.addf %4, %6 : vector<64x512xf32>
    %8 = vector.shape_cast %7 : vector<64x512xf32> to vector<4x16x512xf32>
    %c0_8 = arith.constant 0 : index
    %c0_9 = arith.constant 0 : index
    %c0_10 = arith.constant 0 : index
    %9 = vector.load %arg11[%c0_8, %c0_9, %c0_10] : memref<4x16x512xf32, #tpu.memory_space<vmem>>, vector<4x16x512xf32>
    tpu.vector_store %arg11[%c0_8, %c0_9, %c0_10], %8 {strides = array<i32>} : memref<4x16x512xf32, #tpu.memory_space<vmem>>, vector<4x16x512xf32>,
    %cst_11 = arith.constant 0.000000e+00 : f32
    %10 = vector.broadcast %cst_11 : f32 to vector<16x128xf32>
    %cst_12 = arith.constant 0.000000e+00 : f32
    %11 = vector.broadcast %cst_12 : f32 to vector<16x128xf32>
    %c0_i32 = arith.constant 0 : i32
    %12 = arith.index_cast %c0_i32 : i32 to index
    %c0_13 = arith.constant 0 : index
    %c0_14 = arith.constant 0 : index
    %13 = vector.load %arg11[%12, %c0_13, %c0_14] : memref<4x16x512xf32, #tpu.memory_space<vmem>>, vector<1x16x512xf32>
    %14 = vector.shape_cast %13 : vector<1x16x512xf32> to vector<16x512xf32>
    %15 = arith.truncf %10 : vector<16x128xf32> to vector<16x128xbf16>
    %cst_15 = arith.constant dense<0.000000e+00> : vector<16x512xf32>
    %16 = tpu.matmul %15, %0, %cst_15 {dimension_numbers = #tpu.dot_dimension_numbers<[1], [0], [0], [1], [0, 0, 1, 1], [], []>} : vector<16x128xbf16>, vector<128x512xbf16>, vector<16x512xf32> -> vector<16x512xf32>
    %17 = arith.addf %14, %16 : vector<16x512xf32>
    %18 = vector.extract_strided_slice %17 {offsets = [0, 0], sizes = [16, 384], strides = [1, 1]} : vector<16x512xf32> to vector<16x384xf32>
    %19 = arith.negf %18 : vector<16x384xf32>
    %20 = math.exp %19 : vector<16x384xf32>
    %cst_16 = arith.constant 1.000000e+00 : f32
    %21 = vector.broadcast %cst_16 : f32 to vector<16x384xf32>
    %22 = arith.addf %21, %20 : vector<16x384xf32>
    %23 = arith.divf %21, %22 : vector<16x384xf32>
    %24 = vector.extract_strided_slice %17 {offsets = [0, 384], sizes = [16, 128], strides = [1, 1]} : vector<16x512xf32> to vector<16x128xf32>
    %25 = math.tanh %24 : vector<16x128xf32>
    %26 = vector.extract_strided_slice %23 {offsets = [0, 0], sizes = [16, 128], strides = [1, 1]} : vector<16x384xf32> to vector<16x128xf32>
    %27 = vector.extract_strided_slice %23 {offsets = [0, 128], sizes = [16, 128], strides = [1, 1]} : vector<16x384xf32> to vector<16x128xf32>
    %28 = vector.extract_strided_slice %23 {offsets = [0, 256], sizes = [16, 128], strides = [1, 1]} : vector<16x384xf32> to vector<16x128xf32>
    %29 = arith.mulf %27, %11 : vector<16x128xf32>
    %30 = arith.mulf %26, %25 : vector<16x128xf32>
    %31 = arith.addf %29, %30 : vector<16x128xf32>
    %32 = math.tanh %31 : vector<16x128xf32>
    %33 = arith.mulf %28, %32 : vector<16x128xf32>
    %34 = arith.truncf %33 : vector<16x128xf32> to vector<16x128xbf16>
    %35 = arith.index_cast %c0_i32 : i32 to index
    %c0_17 = arith.constant 0 : index
    %c0_18 = arith.constant 0 : index
    %36 = vector.load %arg12[%35, %c0_17, %c0_18] : memref<4x16x128xbf16, #tpu.memory_space<vmem>>, vector<1x16x128xbf16>
    %37 = vector.shape_cast %36 : vector<1x16x128xbf16> to vector<16x128xbf16>
    %38 = vector.shape_cast %34 : vector<16x128xbf16> to vector<1x16x128xbf16>
    tpu.vector_store %arg12[%35, %c0_17, %c0_18], %38 {strides = array<i32>} : memref<4x16x128xbf16, #tpu.memory_space<vmem>>, vector<1x16x128xbf16>,
    %c1_i32 = arith.constant 1 : i32
    %39 = arith.index_cast %c1_i32 : i32 to index
    %c0_19 = arith.constant 0 : index
    %c0_20 = arith.constant 0 : index
    %40 = vector.load %arg11[%39, %c0_19, %c0_20] : memref<4x16x512xf32, #tpu.memory_space<vmem>>, vector<1x16x512xf32>
    %41 = vector.shape_cast %40 : vector<1x16x512xf32> to vector<16x512xf32>
    %42 = arith.truncf %33 : vector<16x128xf32> to vector<16x128xbf16>
    %cst_21 = arith.constant dense<0.000000e+00> : vector<16x512xf32>
    %43 = tpu.matmul %42, %0, %cst_21 {dimension_numbers = #tpu.dot_dimension_numbers<[1], [0], [0], [1], [0, 0, 1, 1], [], []>} : vector<16x128xbf16>, vector<128x512xbf16>, vector<16x512xf32> -> vector<16x512xf32>
    %44 = arith.addf %41, %43 : vector<16x512xf32>
    %45 = vector.extract_strided_slice %44 {offsets = [0, 0], sizes = [16, 384], strides = [1, 1]} : vector<16x512xf32> to vector<16x384xf32>
    %46 = arith.negf %45 : vector<16x384xf32>
    %47 = math.exp %46 : vector<16x384xf32>
    %cst_22 = arith.constant 1.000000e+00 : f32
    %48 = vector.broadcast %cst_22 : f32 to vector<16x384xf32>
    %49 = arith.addf %48, %47 : vector<16x384xf32>
    %50 = arith.divf %48, %49 : vector<16x384xf32>
    %51 = vector.extract_strided_slice %44 {offsets = [0, 384], sizes = [16, 128], strides = [1, 1]} : vector<16x512xf32> to vector<16x128xf32>
    %52 = math.tanh %51 : vector<16x128xf32>
    %53 = vector.extract_strided_slice %50 {offsets = [0, 0], sizes = [16, 128], strides = [1, 1]} : vector<16x384xf32> to vector<16x128xf32>
    %54 = vector.extract_strided_slice %50 {offsets = [0, 128], sizes = [16, 128], strides = [1, 1]} : vector<16x384xf32> to vector<16x128xf32>
    %55 = vector.extract_strided_slice %50 {offsets = [0, 256], sizes = [16, 128], strides = [1, 1]} : vector<16x384xf32> to vector<16x128xf32>
    %56 = arith.mulf %54, %31 : vector<16x128xf32>
    %57 = arith.mulf %53, %52 : vector<16x128xf32>
    %58 = arith.addf %56, %57 : vector<16x128xf32>
    %59 = math.tanh %58 : vector<16x128xf32>
    %60 = arith.mulf %55, %59 : vector<16x128xf32>
    %61 = arith.truncf %60 : vector<16x128xf32> to vector<16x128xbf16>
    %62 = arith.index_cast %c1_i32 : i32 to index
    %c0_23 = arith.constant 0 : index
    %c0_24 = arith.constant 0 : index
    %63 = vector.load %arg12[%62, %c0_23, %c0_24] : memref<4x16x128xbf16, #tpu.memory_space<vmem>>, vector<1x16x128xbf16>
    %64 = vector.shape_cast %63 : vector<1x16x128xbf16> to vector<16x128xbf16>
    %65 = vector.shape_cast %61 : vector<16x128xbf16> to vector<1x16x128xbf16>
    tpu.vector_store %arg12[%62, %c0_23, %c0_24], %65 {strides = array<i32>} : memref<4x16x128xbf16, #tpu.memory_space<vmem>>, vector<1x16x128xbf16>,
    %c2_i32 = arith.constant 2 : i32
    %66 = arith.index_cast %c2_i32 : i32 to index
    %c0_25 = arith.constant 0 : index
    %c0_26 = arith.constant 0 : index
    %67 = vector.load %arg11[%66, %c0_25, %c0_26] : memref<4x16x512xf32, #tpu.memory_space<vmem>>, vector<1x16x512xf32>
    %68 = vector.shape_cast %67 : vector<1x16x512xf32> to vector<16x512xf32>
    %69 = arith.truncf %60 : vector<16x128xf32> to vector<16x128xbf16>
    %cst_27 = arith.constant dense<0.000000e+00> : vector<16x512xf32>
    %70 = tpu.matmul %69, %0, %cst_27 {dimension_numbers = #tpu.dot_dimension_numbers<[1], [0], [0], [1], [0, 0, 1, 1], [], []>} : vector<16x128xbf16>, vector<128x512xbf16>, vector<16x512xf32> -> vector<16x512xf32>
    %71 = arith.addf %68, %70 : vector<16x512xf32>
    %72 = vector.extract_strided_slice %71 {offsets = [0, 0], sizes = [16, 384], strides = [1, 1]} : vector<16x512xf32> to vector<16x384xf32>
    %73 = arith.negf %72 : vector<16x384xf32>
    %74 = math.exp %73 : vector<16x384xf32>
    %cst_28 = arith.constant 1.000000e+00 : f32
    %75 = vector.broadcast %cst_28 : f32 to vector<16x384xf32>
    %76 = arith.addf %75, %74 : vector<16x384xf32>
    %77 = arith.divf %75, %76 : vector<16x384xf32>
    %78 = vector.extract_strided_slice %71 {offsets = [0, 384], sizes = [16, 128], strides = [1, 1]} : vector<16x512xf32> to vector<16x128xf32>
    %79 = math.tanh %78 : vector<16x128xf32>
    %80 = vector.extract_strided_slice %77 {offsets = [0, 0], sizes = [16, 128], strides = [1, 1]} : vector<16x384xf32> to vector<16x128xf32>
    %81 = vector.extract_strided_slice %77 {offsets = [0, 128], sizes = [16, 128], strides = [1, 1]} : vector<16x384xf32> to vector<16x128xf32>
    %82 = vector.extract_strided_slice %77 {offsets = [0, 256], sizes = [16, 128], strides = [1, 1]} : vector<16x384xf32> to vector<16x128xf32>
    %83 = arith.mulf %81, %58 : vector<16x128xf32>
    %84 = arith.mulf %80, %79 : vector<16x128xf32>
    %85 = arith.addf %83, %84 : vector<16x128xf32>
    %86 = math.tanh %85 : vector<16x128xf32>
    %87 = arith.mulf %82, %86 : vector<16x128xf32>
    %88 = arith.truncf %87 : vector<16x128xf32> to vector<16x128xbf16>
    %89 = arith.index_cast %c2_i32 : i32 to index
    %c0_29 = arith.constant 0 : index
    %c0_30 = arith.constant 0 : index
    %90 = vector.load %arg12[%89, %c0_29, %c0_30] : memref<4x16x128xbf16, #tpu.memory_space<vmem>>, vector<1x16x128xbf16>
    %91 = vector.shape_cast %90 : vector<1x16x128xbf16> to vector<16x128xbf16>
    %92 = vector.shape_cast %88 : vector<16x128xbf16> to vector<1x16x128xbf16>
    tpu.vector_store %arg12[%89, %c0_29, %c0_30], %92 {strides = array<i32>} : memref<4x16x128xbf16, #tpu.memory_space<vmem>>, vector<1x16x128xbf16>,
    %c3_i32 = arith.constant 3 : i32
    %93 = arith.index_cast %c3_i32 : i32 to index
    %c0_31 = arith.constant 0 : index
    %c0_32 = arith.constant 0 : index
    %94 = vector.load %arg11[%93, %c0_31, %c0_32] : memref<4x16x512xf32, #tpu.memory_space<vmem>>, vector<1x16x512xf32>
    %95 = vector.shape_cast %94 : vector<1x16x512xf32> to vector<16x512xf32>
    %96 = arith.truncf %87 : vector<16x128xf32> to vector<16x128xbf16>
    %cst_33 = arith.constant dense<0.000000e+00> : vector<16x512xf32>
    %97 = tpu.matmul %96, %0, %cst_33 {dimension_numbers = #tpu.dot_dimension_numbers<[1], [0], [0], [1], [0, 0, 1, 1], [], []>} : vector<16x128xbf16>, vector<128x512xbf16>, vector<16x512xf32> -> vector<16x512xf32>
    %98 = arith.addf %95, %97 : vector<16x512xf32>
    %99 = vector.extract_strided_slice %98 {offsets = [0, 0], sizes = [16, 384], strides = [1, 1]} : vector<16x512xf32> to vector<16x384xf32>
    %100 = arith.negf %99 : vector<16x384xf32>
    %101 = math.exp %100 : vector<16x384xf32>
    %cst_34 = arith.constant 1.000000e+00 : f32
    %102 = vector.broadcast %cst_34 : f32 to vector<16x384xf32>
    %103 = arith.addf %102, %101 : vector<16x384xf32>
    %104 = arith.divf %102, %103 : vector<16x384xf32>
    %105 = vector.extract_strided_slice %98 {offsets = [0, 384], sizes = [16, 128], strides = [1, 1]} : vector<16x512xf32> to vector<16x128xf32>
    %106 = math.tanh %105 : vector<16x128xf32>
    %107 = vector.extract_strided_slice %104 {offsets = [0, 0], sizes = [16, 128], strides = [1, 1]} : vector<16x384xf32> to vector<16x128xf32>
    %108 = vector.extract_strided_slice %104 {offsets = [0, 128], sizes = [16, 128], strides = [1, 1]} : vector<16x384xf32> to vector<16x128xf32>
    %109 = vector.extract_strided_slice %104 {offsets = [0, 256], sizes = [16, 128], strides = [1, 1]} : vector<16x384xf32> to vector<16x128xf32>
    %110 = arith.mulf %108, %85 : vector<16x128xf32>
    %111 = arith.mulf %107, %106 : vector<16x128xf32>
    %112 = arith.addf %110, %111 : vector<16x128xf32>
    %113 = math.tanh %112 : vector<16x128xf32>
    %114 = arith.mulf %109, %113 : vector<16x128xf32>
    %115 = arith.truncf %114 : vector<16x128xf32> to vector<16x128xbf16>
    %116 = arith.index_cast %c3_i32 : i32 to index
    %c0_35 = arith.constant 0 : index
    %c0_36 = arith.constant 0 : index
    %117 = vector.load %arg12[%116, %c0_35, %c0_36] : memref<4x16x128xbf16, #tpu.memory_space<vmem>>, vector<1x16x128xbf16>
    %118 = vector.shape_cast %117 : vector<1x16x128xbf16> to vector<16x128xbf16>
    %119 = vector.shape_cast %115 : vector<16x128xbf16> to vector<1x16x128xbf16>
    tpu.vector_store %arg12[%116, %c0_35, %c0_36], %119 {strides = array<i32>} : memref<4x16x128xbf16, #tpu.memory_space<vmem>>, vector<1x16x128xbf16>,
    %c4_i32 = arith.constant 4 : i32
    %cst_37 = arith.constant 0.000000e+00 : f32
    %120 = vector.broadcast %cst_37 : f32 to vector<16x128xf32>
    %c0_38 = arith.constant 0 : index
    %c0_39 = arith.constant 0 : index
    %c0_40 = arith.constant 0 : index
    %121 = vector.load %arg12[%c0_38, %c0_39, %c0_40] : memref<4x16x128xbf16, #tpu.memory_space<vmem>>, vector<1x16x128xbf16>
    %122 = vector.shape_cast %121 : vector<1x16x128xbf16> to vector<16x128xbf16>
    %c0_41 = arith.constant 0 : index
    %c0_42 = arith.constant 0 : index
    %c0_43 = arith.constant 0 : index
    %123 = vector.load %arg5[%c0_41, %c0_42, %c0_43] : memref<4x128x128xbf16, #tpu.memory_space<vmem>>, vector<1x128x128xbf16>
    %124 = vector.shape_cast %123 : vector<1x128x128xbf16> to vector<128x128xbf16>
    %cst_44 = arith.constant dense<0.000000e+00> : vector<16x128xf32>
    %125 = tpu.matmul %122, %124, %cst_44 {dimension_numbers = #tpu.dot_dimension_numbers<[1], [0], [0], [1], [0, 0, 1, 1], [], []>} : vector<16x128xbf16>, vector<128x128xbf16>, vector<16x128xf32> -> vector<16x128xf32>
    %126 = arith.addf %120, %125 : vector<16x128xf32>
    %c1 = arith.constant 1 : index
    %c0_45 = arith.constant 0 : index
    %c0_46 = arith.constant 0 : index
    %127 = vector.load %arg12[%c1, %c0_45, %c0_46] : memref<4x16x128xbf16, #tpu.memory_space<vmem>>, vector<1x16x128xbf16>
    %128 = vector.shape_cast %127 : vector<1x16x128xbf16> to vector<16x128xbf16>
    %c1_47 = arith.constant 1 : index
    %c0_48 = arith.constant 0 : index
    %c0_49 = arith.constant 0 : index
    %129 = vector.load %arg5[%c1_47, %c0_48, %c0_49] : memref<4x128x128xbf16, #tpu.memory_space<vmem>>, vector<1x128x128xbf16>
    %130 = vector.shape_cast %129 : vector<1x128x128xbf16> to vector<128x128xbf16>
    %cst_50 = arith.constant dense<0.000000e+00> : vector<16x128xf32>
    %131 = tpu.matmul %128, %130, %cst_50 {dimension_numbers = #tpu.dot_dimension_numbers<[1], [0], [0], [1], [0, 0, 1, 1], [], []>} : vector<16x128xbf16>, vector<128x128xbf16>, vector<16x128xf32> -> vector<16x128xf32>
    %132 = arith.addf %126, %131 : vector<16x128xf32>
    %c2 = arith.constant 2 : index
    %c0_51 = arith.constant 0 : index
    %c0_52 = arith.constant 0 : index
    %133 = vector.load %arg12[%c2, %c0_51, %c0_52] : memref<4x16x128xbf16, #tpu.memory_space<vmem>>, vector<1x16x128xbf16>
    %134 = vector.shape_cast %133 : vector<1x16x128xbf16> to vector<16x128xbf16>
    %c2_53 = arith.constant 2 : index
    %c0_54 = arith.constant 0 : index
    %c0_55 = arith.constant 0 : index
    %135 = vector.load %arg5[%c2_53, %c0_54, %c0_55] : memref<4x128x128xbf16, #tpu.memory_space<vmem>>, vector<1x128x128xbf16>
    %136 = vector.shape_cast %135 : vector<1x128x128xbf16> to vector<128x128xbf16>
    %cst_56 = arith.constant dense<0.000000e+00> : vector<16x128xf32>
    %137 = tpu.matmul %134, %136, %cst_56 {dimension_numbers = #tpu.dot_dimension_numbers<[1], [0], [0], [1], [0, 0, 1, 1], [], []>} : vector<16x128xbf16>, vector<128x128xbf16>, vector<16x128xf32> -> vector<16x128xf32>
    %138 = arith.addf %132, %137 : vector<16x128xf32>
    %c3 = arith.constant 3 : index
    %c0_57 = arith.constant 0 : index
    %c0_58 = arith.constant 0 : index
    %139 = vector.load %arg12[%c3, %c0_57, %c0_58] : memref<4x16x128xbf16, #tpu.memory_space<vmem>>, vector<1x16x128xbf16>
    %140 = vector.shape_cast %139 : vector<1x16x128xbf16> to vector<16x128xbf16>
    %c3_59 = arith.constant 3 : index
    %c0_60 = arith.constant 0 : index
    %c0_61 = arith.constant 0 : index
    %141 = vector.load %arg5[%c3_59, %c0_60, %c0_61] : memref<4x128x128xbf16, #tpu.memory_space<vmem>>, vector<1x128x128xbf16>
    %142 = vector.shape_cast %141 : vector<1x128x128xbf16> to vector<128x128xbf16>
    %cst_62 = arith.constant dense<0.000000e+00> : vector<16x128xf32>
    %143 = tpu.matmul %140, %142, %cst_62 {dimension_numbers = #tpu.dot_dimension_numbers<[1], [0], [0], [1], [0, 0, 1, 1], [], []>} : vector<16x128xbf16>, vector<128x128xbf16>, vector<16x128xf32> -> vector<16x128xf32>
    %144 = arith.addf %138, %143 : vector<16x128xf32>
    %c0_63 = arith.constant 0 : index
    %c0_64 = arith.constant 0 : index
    %145 = vector.load %arg6[%c0_63, %c0_64] : memref<1x128xf32, #tpu.memory_space<vmem>>, vector<1x128xf32>
    %146 = vector.broadcast %145 : vector<1x128xf32> to vector<16x128xf32>
    %147 = arith.addf %144, %146 : vector<16x128xf32>
    %148 = arith.truncf %147 : vector<16x128xf32> to vector<16x128xbf16>
    %c0_65 = arith.constant 0 : index
    %c0_66 = arith.constant 0 : index
    %149 = vector.load %arg7[%c0_65, %c0_66] : memref<128x128xbf16, #tpu.memory_space<vmem>>, vector<128x128xbf16>
    %cst_67 = arith.constant dense<0.000000e+00> : vector<16x128xf32>
    %150 = tpu.matmul %148, %149, %cst_67 {dimension_numbers = #tpu.dot_dimension_numbers<[1], [0], [0], [1], [0, 0, 1, 1], [], []>} : vector<16x128xbf16>, vector<128x128xbf16>, vector<16x128xf32> -> vector<16x128xf32>
    %c0_68 = arith.constant 0 : index
    %c0_69 = arith.constant 0 : index
    %151 = vector.load %arg8[%c0_68, %c0_69] : memref<16x16xf32, #tpu.memory_space<vmem>>, vector<16x16xf32>
    %cst_70 = arith.constant dense<0.000000e+00> : vector<16x128xf32>
    %152 = tpu.matmul %151, %150, %cst_70 {dimension_numbers = #tpu.dot_dimension_numbers<[1], [0], [0], [1], [0, 0, 1, 1], [], []>} : vector<16x16xf32>, vector<16x128xf32>, vector<16x128xf32> -> vector<16x128xf32>
    %c0_71 = arith.constant 0 : index
    %c0_72 = arith.constant 0 : index
    %153 = vector.load %arg9[%c0_71, %c0_72] : memref<16x128xf32, #tpu.memory_space<vmem>>, vector<16x128xf32>
    %154 = arith.addf %152, %153 : vector<16x128xf32>
    %cst_73 = arith.constant 0.000000e+00 : f32
    %155 = vector.broadcast %cst_73 : f32 to vector<16x128xf32>
    %156 = arith.maximumf %154, %155 : vector<16x128xf32>
    %c0_74 = arith.constant 0 : index
    %c0_75 = arith.constant 0 : index
    %157 = vector.load %arg10[%c0_74, %c0_75] : memref<16x128xf32, #tpu.memory_space<vmem>>, vector<16x128xf32>
    tpu.vector_store %arg10[%c0_74, %c0_75], %156 {strides = array<i32>} : memref<16x128xf32, #tpu.memory_space<vmem>>, vector<16x128xf32>,
    return
  }
  func.func @transform_0(%arg0: i32) -> (i32, i32, i32) {
    %c0_i32 = arith.constant 0 : i32
    %c0_i32_0 = arith.constant 0 : i32
    %c0_i32_1 = arith.constant 0 : i32
    return %c0_i32, %arg0, %c0_i32_0 : i32, i32, i32
  }
  func.func @transform_1(%arg0: i32) -> (i32, i32) {
    %c0_i32 = arith.constant 0 : i32
    %c0_i32_0 = arith.constant 0 : i32
    %c0_i32_1 = arith.constant 0 : i32
    return %c0_i32, %c0_i32_0 : i32, i32
  }
  func.func @transform_2(%arg0: i32) -> (i32, i32) {
    %c0_i32 = arith.constant 0 : i32
    %c0_i32_0 = arith.constant 0 : i32
    %c0_i32_1 = arith.constant 0 : i32
    return %c0_i32, %c0_i32_0 : i32, i32
  }
  func.func @transform_3(%arg0: i32) -> (i32, i32) {
    %c0_i32 = arith.constant 0 : i32
    %c0_i32_0 = arith.constant 0 : i32
    %c0_i32_1 = arith.constant 0 : i32
    return %c0_i32, %c0_i32_0 : i32, i32
  }
  func.func @transform_4(%arg0: i32) -> (i32, i32, i32) {
    %c0_i32 = arith.constant 0 : i32
    %c0_i32_0 = arith.constant 0 : i32
    %c0_i32_1 = arith.constant 0 : i32
    %c0_i32_2 = arith.constant 0 : i32
    return %c0_i32, %c0_i32_0, %c0_i32_1 : i32, i32, i32
  }
  func.func @transform_5(%arg0: i32) -> (i32, i32) {
    %c0_i32 = arith.constant 0 : i32
    %c0_i32_0 = arith.constant 0 : i32
    %c0_i32_1 = arith.constant 0 : i32
    return %c0_i32, %c0_i32_0 : i32, i32
  }
  func.func @transform_6(%arg0: i32) -> (i32, i32) {
    %c0_i32 = arith.constant 0 : i32
    %c0_i32_0 = arith.constant 0 : i32
    %c0_i32_1 = arith.constant 0 : i32
    return %c0_i32, %c0_i32_0 : i32, i32
  }
  func.func @transform_7(%arg0: i32) -> (i32, i32) {
    %c0_i32 = arith.constant 0 : i32
    %c0_i32_0 = arith.constant 0 : i32
    %c0_i32_1 = arith.constant 0 : i32
    return %c0_i32, %c0_i32_0 : i32, i32
  }
  func.func @transform_8(%arg0: i32) -> (i32, i32) {
    %c0_i32 = arith.constant 0 : i32
    %c0_i32_0 = arith.constant 0 : i32
    %c0_i32_1 = arith.constant 0 : i32
    return %c0_i32, %c0_i32_0 : i32, i32
  }
  func.func @transform_9(%arg0: i32) -> (i32, i32) {
    %c0_i32 = arith.constant 0 : i32
    %c0_i32_0 = arith.constant 0 : i32
    return %arg0, %c0_i32 : i32, i32
  }
}

</mosaic_0001>

<bundles_post_ra>
// kernel: hdgsm_forward.1
= control target key start
LH: loop header
LB: loop body
LE: loop exit
PB: predicated region body
PF: predicated region fallthrough
CT: control target
= control target key end

     0   :  { %s2907_s30 = smov 0   ;;  %s2909_s10 = smov 0   ;;  %s3556_s0 = inlined_call_operand.vmem [shape: bf16[4,32,8], index: 0, kind: input, shape index: {}]   ;;  %s3557_s1 = inlined_call_operand.vmem [shape: bf16[8,512], index: 1, kind: input, shape index: {}]   ;;  %s3558_s2 = inlined_call_operand.vmem [shape: bf16[128,512], index: 2, kind: input, shape index: {}]   ;;  %s3559_s3 = inlined_call_operand.vmem [shape: f32[1,512], index: 3, kind: input, shape index: {}]   ;;  %s3560_s4 = inlined_call_operand.vmem [shape: bf16[4,128,128], index: 4, kind: input, shape index: {}]   ;;  %s3561_s5 = inlined_call_operand.vmem [shape: f32[1,128], index: 5, kind: input, shape index: {}]   ;;  %s3562_s6 = inlined_call_operand.vmem [shape: bf16[128,128], index: 6, kind: input, shape index: {}]   ;;  %s3563_s7 = inlined_call_operand.vmem [shape: f32[16,16], index: 7, kind: input, shape index: {}]   ;;  %s3564_s8 = inlined_call_operand.vmem [shape: f32[16,128], index: 8, kind: input, shape index: {}]   ;;  %s3565_s9 = inlined_call_operand.vmem [shape: f32[32,128], index: 9, kind: output, shape index: {}]  }
   0x1   :  { %s2911_s11 = smov 0  }
   0x2 LB: > { %s2176_s12 = sadd.s32 4294967295, %s2852_s11   ;;  %s2924_s13 = sadd.s32 1, %s2852_s11   ;;  %s2852_s11 = sphi %s2911_s11, %s3568_s11   ;;  %s2848_s10 = sphi %s2909_s10, %s3567_s10   ;;  %s2844_s30 = sphi %s2907_s30, %s3566_s30  }
   0x3   : > { %s23_s14 = ssub.s32 %s2852_s11, %s2924_s13  ;;  %s26_s15 = sadd.s32 1, %s2848_s10 }
   0x4   : > { %p24_p0 = scmp.eq.s32.totalorder %s23_s14, 0  ;;  %p33_p1 = scmp.ne.s32.totalorder %s2848_s10, %s2844_s30 }
   0x5   : > { %p34_p2 = scmp.eq.s32.totalorder %s2852_s11, 0  ;;  %p2179_p4 = scmp.ge.s32.totalorder %s2852_s11, 2 }
   0x6   : > { %s2933_s16 = scalar_select %p24_p0, %s2848_s10, %s26_s15  }
   0x7   : > { %p35_p3 = por %p34_p2, %p33_p1  ;;  %277 = sbr.rel (%p2179_p4) target bundleno = 21 (0x15), region = 48 }
   0xe   : > { %280 = sbr.rel (!%p35_p3) target bundleno = 21 (0x15), region = 52  ;;  %s282_s17 = sand.u32 (%p35_p3), 1, %s2848_s10  }
   0xf   : > { %s2354_s18 = sshll.u32 (%p35_p3), %s2852_s11, 3  ;;  %s2180_s19 = sshll.u32 (%p35_p3), %s282_s17, 5 }
  0x10   : > { %s287_s22 = scalar_lea.vmem (%p35_p3), %s3556_s0, %s2354_s18  ;;  %s284_s23 = scalar_lea.vmem (%p35_p3), [#allocation4], %s2180_s19 }
  0x11   : > { %v303_v0 = vld [vmem:[%s287_s22] sm:$0xff] (%p35_p3)   ;;  %v307_v1 = vld [vmem:[%s287_s22 + $0x10] sm:$0xff] (%p35_p3)  }
  0x12   : > { %v311_v2 = vld [vmem:[%s287_s22 + $0x20] sm:$0xff] (%p35_p3)   ;;  %304 = vst [vmem:[%s284_s23] sm:$0xff] (%p35_p3), %v303_v0   ;;  %308 = vst [vmem:[%s284_s23 + $0x8] sm:$0xff] (%p35_p3), %v307_v1   ;;  %v315_v3 = vld [vmem:[%s287_s22 + $0x30] sm:$0xff] (%p35_p3)  }
  0x13   : > { %312 = vst [vmem:[%s284_s23 + $0x10] sm:$0xff] (%p35_p3), %v311_v2   ;;  %316 = vst [vmem:[%s284_s23 + $0x18] sm:$0xff] (%p35_p3), %v315_v3  }
  0x15 PF: > { %p2183_p5 = scmp.ge.s32.totalorder %s2852_s11, 1  ;;  %p356_p6 = scmp.lt.s32.totalorder %s2852_s11, 3 }
  0x17   : > { %p357_p7 = pnand %p2183_p5, %p356_p6 }
  0x18   : > { %v446_v4 = vld [vmem:[%s3557_s1] sm:$0xff] (!%p357_p7)  ;;  %vm513_vm0 = vcmask (!%p357_p7), 1043456   ;;  %v447_v5 = vld [vmem:[%s3557_s1 + $0x8] sm:$0xff] (!%p357_p7)  ;;  %s363_s28 = sand.u32 (!%p357_p7), 1, %s2844_s30   ;;  %v2854_v10 = vmov (!%p357_p7), 0   ;;  %vm500_vm1 = vcmask (!%p357_p7), 64512   ;;  %v450_v49 = vlaneseq (!%p357_p7) }
  0x19   : > { %360 = sbr.rel (%p357_p7) target bundleno = 1774 (0x6ee), region = 93  ;;  %v2192_v6 = vcombine.high (!%p357_p7), %v446_v4, %v446_v4  ;;  %v2194_v7 = vcombine.high (!%p357_p7), %v447_v5, %v447_v5  ;;  %v2191_v8 = vcombine.low (!%p357_p7), %v446_v4, %v446_v4  ;;  %v2193_v9 = vcombine.low (!%p357_p7), %v447_v5, %v447_v5  ;;  %558 = vmatprep.mubr.bf16.mxu0 (!%p357_p7), %v2854_v10  ;;  %s2184_s29 = sshll.u32 (!%p357_p7), %s363_s28, 5  ;;  %v2954_v11 = vld [vmem:[%s3558_s2 + $0x4] ss:$16 sps:$4 sm:$0xff] (!%p357_p7)   ;;  %v2960_v12 = vld [vmem:[%s3558_s2 + $0xc] ss:$16 sps:$4 sm:$0xff] (!%p357_p7)  }
  0x1a   : > { %631 = vmatprep.mubr.bf16.mxu1 (!%p357_p7), %v2854_v10  ;;  %s2966_s30 = scalar_lea.vmem (!%p357_p7), [#allocation4], %s2184_s29  ;;  %v2972_v16 = vld [vmem:[%s3558_s2] ss:$16 sps:$4 sm:$0xff] (!%p357_p7)   ;;  %v2977_v17 = vld [vmem:[%s3558_s2 + $0x8] ss:$16 sps:$4 sm:$0xff] (!%p357_p7)   ;;  %v451_v50 = vshrl.u32 (!%p357_p7), %v450_v49, 7 }
  0x1b   : > { %2195 = vmatprep.subr.msk.bf16.mxu0 (!%p357_p7), %vm513_vm0, %v2192_v6  ;;  %2200 = vmatprep.subr.msk.bf16.mxu1 (!%p357_p7), %vm513_vm0, %v2194_v7  ;;  %v515_v13 = vsel (!%p357_p7), %vm513_vm0, %v2191_v8, 0  ;;  %v521_v14 = vsel (!%p357_p7), %vm513_vm0, %v2193_v9, 0  ;;  %v2610_v15 = vld [vmem:[%s2966_s30] sm:$0xff] (!%p357_p7)   ;;  %v2989_v19 = vld [vmem:[%s3558_s2 + $0x2c] ss:$16 sps:$4 sm:$0xff] (!%p357_p7)   ;;  %v2636_v33 = vld [vmem:[%s2966_s30 + $0x10] sm:$0xff] (!%p357_p7)  }
  0x1c   : > { %527 = vmatpush1.bf16.msra.mxu0 (!%p357_p7), %v515_v13  ;;  %600 = vmatpush1.bf16.msra.mxu1 (!%p357_p7), %v521_v14  ;;  %v2984_v18 = vld [vmem:[%s3558_s2 + $0x24] ss:$16 sps:$4 sm:$0xff] (!%p357_p7)   ;;  %v2996_v20 = vld [vmem:[%s3558_s2 + $0x20] ss:$16 sps:$4 sm:$0xff] (!%p357_p7)   ;;  %v3003_v21 = vld [vmem:[%s3558_s2 + $0x28] ss:$16 sps:$4 sm:$0xff] (!%p357_p7)  }
  0x1d   : > { %872 = vmatprep.subr.bf16.mxu0 (!%p357_p7), %v2954_v11  ;;  %915 = vmatprep.subr.bf16.mxu1 (!%p357_p7), %v2960_v12  ;;  %v3010_v22 = vld [vmem:[%s3558_s2 + $0x44] ss:$16 sps:$4 sm:$0xff] (!%p357_p7)   ;;  %v2623_v23 = vld [vmem:[%s2966_s30 + $0x8] sm:$0xff] (!%p357_p7)   ;;  %v3023_v25 = vld [vmem:[%s3558_s2 + $0x40] ss:$16 sps:$4 sm:$0xff] (!%p357_p7)   ;;  %v452_v51 = vsub.s32 (!%p357_p7), 0, %v451_v50 }
  0x1e   : > { %v3018_v24 = vld [vmem:[%s3558_s2 + $0x4c] ss:$16 sps:$4 sm:$0xff] (!%p357_p7)   ;;  %v3030_v26 = vld [vmem:[%s3558_s2 + $0x48] ss:$16 sps:$4 sm:$0xff] (!%p357_p7)   ;;  %v3037_v27 = vld [vmem:[%s3558_s2 + $0x64] ss:$16 sps:$4 sm:$0xff] (!%p357_p7)  }
  0x1f   : > { %2196 = vmatmul.mubr.msk.bf16.vlgmr.msra.gmra.mrb[0].mxu0 (!%p357_p7), %vm500_vm1, %v2610_v15  ;;  %2201 = vmatmul.mubr.msk.bf16.vlgmr.msra.gmra.mrb[0].mxu1 (!%p357_p7), %vm500_vm1, %v2610_v15  ;;  %v3042_v28 = vld [vmem:[%s3558_s2 + $0x6c] ss:$16 sps:$4 sm:$0xff] (!%p357_p7)   ;;  %v3049_v29 = vld [vmem:[%s3558_s2 + $0x60] ss:$16 sps:$4 sm:$0xff] (!%p357_p7)   ;;  %v3056_v30 = vld [vmem:[%s3558_s2 + $0x68] ss:$16 sps:$4 sm:$0xff] (!%p357_p7)  }
  0x20   : > { %873 = vmatpush1.bf16.msra.mxu0 %v2972_v16  ;;  %916 = vmatpush1.bf16.msra.mxu1 %v2977_v17  ;;  %v3063_v31 = vld [vmem:[%s3558_s2 + $0x84] ss:$16 sps:$4 sm:$0xff]   ;;  %v3068_v32 = vld [vmem:[%s3558_s2 + $0x8c] ss:$16 sps:$4 sm:$0xff]   ;;  %v3076_v34 = vld [vmem:[%s3558_s2 + $0x80] ss:$16 sps:$4 sm:$0xff]  }
  0x21   : > { %874 = vmatprep.subr.bf16.mxu0 %v2984_v18  ;;  %917 = vmatprep.subr.bf16.mxu1 %v2989_v19  ;;  %v3081_v35 = vld [vmem:[%s3558_s2 + $0x88] ss:$16 sps:$4 sm:$0xff]   ;;  %v3088_v36 = vld [vmem:[%s3558_s2 + $0xa4] ss:$16 sps:$4 sm:$0xff]   ;;  %v3095_v37 = vld [vmem:[%s3558_s2 + $0xac] ss:$16 sps:$4 sm:$0xff]  }
  0x22   : > { %568 = vmatprep.mubr.bf16.mxu0 %v2854_v10  ;;  %641 = vmatprep.mubr.bf16.mxu1 %v2854_v10  ;;  %v3102_v38 = vld [vmem:[%s3558_s2 + $0xa0] ss:$16 sps:$4 sm:$0xff]   ;;  %v3107_v39 = vld [vmem:[%s3558_s2 + $0xa8] ss:$16 sps:$4 sm:$0xff]   ;;  %v3114_v40 = vld [vmem:[%s3558_s2 + $0xc4] ss:$16 sps:$4 sm:$0xff]  }
  0x23   : > { %v3121_v41 = vld [vmem:[%s3558_s2 + $0xcc] ss:$16 sps:$4 sm:$0xff]   ;;  %v3129_v43 = vld [vmem:[%s3558_s2 + $0xc0] ss:$16 sps:$4 sm:$0xff]   ;;  %v3134_v44 = vld [vmem:[%s3558_s2 + $0xc8] ss:$16 sps:$4 sm:$0xff]  }
  0x24   : > { %875 = vmatpush1.bf16.msra.mxu0 %v2996_v20  ;;  %918 = vmatpush1.bf16.msra.mxu1 %v3003_v21  ;;  %v2649_v42 = vld [vmem:[%s2966_s30 + $0x18] sm:$0xff]   ;;  %v3139_v45 = vld [vmem:[%s3558_s2 + $0xe4] ss:$16 sps:$4 sm:$0xff]   ;;  %v3153_v47 = vld [vmem:[%s3558_s2 + $0xe0] ss:$16 sps:$4 sm:$0xff]   ;;  %v456_v53 = vsub.s32 1, %v451_v50 }
  0x25   : > { %876 = vmatprep.subr.bf16.mxu0 %v3010_v22  ;;  %919 = vmatprep.subr.bf16.mxu1 %v3018_v24  ;;  %v3144_v46 = vld [vmem:[%s3558_s2 + $0xec] ss:$16 sps:$4 sm:$0xff]   ;;  %v3158_v48 = vld [vmem:[%s3558_s2 + $0xe8] ss:$16 sps:$4 sm:$0xff]   ;;  %v448_v52 = vld [vmem:[%s3559_s3] sm:$0xf] }
  0x26   : > { %v3211_v54 = vrot.slane %v448_v52, %v452_v51  ;;  %v3213_v55 = vrot.slane %v448_v52, %v456_v53  ;;  %v460_v57 = vsub.s32 2, %v451_v50  ;;  %v464_v2 = vsub.s32 3, %v451_v50  ;;  %s2185_s26 = sshll.u32 %s2176_s12, 1 }
  0x27   : > { %2197 = vmatmul.mubr.msk.bf16.gmra.mrb[4].mxu0 %vm500_vm1, %v2623_v23  ;;  %2202 = vmatmul.mubr.msk.bf16.gmra.mrb[4].mxu1 %vm500_vm1, %v2623_v23  ;;  %vm2856_vm2 = vmmov 0   ;;  %vm2028_vm3 = vcmask 130048   ;;  %p400_p8 = scmp.lt.s32.totalorder %s2185_s26, 3 }
  0x28   : > { %877 = vmatpush1.bf16.msra.mxu0 %v3023_v25  ;;  %920 = vmatpush1.bf16.msra.mxu1 %v3030_v26  ;;  %v3218_v6 = vrot.slane %v448_v52, %v460_v57  ;;  %v3221_v14 = vrot.slane %v448_v52, %v464_v2 }
  0x29   : > { %878 = vmatprep.subr.bf16.mxu0 %v3037_v27  ;;  %921 = vmatprep.subr.bf16.mxu1 %v3042_v28  ;;  %s3570_s26 = smov (!%p400_p8, %s2185_s26), 3 }
  0x2a   : > { %578 = vmatprep.mubr.bf16.mxu0 %v2854_v10  ;;  %651 = vmatprep.mubr.bf16.mxu1 %v2854_v10  ;;  %s2186_s14 = sshll.u32 %s3570_s26, 3 }
  0x2b   : > { %s403_s11 = scalar_lea.vmem %s3565_s9, %s2186_s14 }
  0x2c   : > { %879 = vmatpush1.bf16.msra.mxu0 %v3049_v29  ;;  %922 = vmatpush1.bf16.msra.mxu1 %v3056_v30 }
  0x2d   : > { %880 = vmatprep.subr.bf16.mxu0 %v3063_v31  ;;  %923 = vmatprep.subr.bf16.mxu1 %v3068_v32 }
  0x2f   : > { %2198 = vmatmul.mubr.msk.bf16.gmra.mrb[8].mxu0 %vm500_vm1, %v2636_v33  ;;  %2203 = vmatmul.mubr.msk.bf16.gmra.mrb[8].mxu1 %vm500_vm1, %v2636_v33 }
  0x30   : > { %881 = vmatpush1.bf16.msra.mxu0 %v3076_v34  ;;  %924 = vmatpush1.bf16.msra.mxu1 %v3081_v35 }
  0x31   : > { %882 = vmatprep.subr.bf16.mxu0 %v3088_v36  ;;  %925 = vmatprep.subr.bf16.mxu1 %v3095_v37 }
  0x32   : > { %588 = vmatprep.mubr.bf16.mxu0 %v2854_v10  ;;  %661 = vmatprep.mubr.bf16.mxu1 %v2854_v10 }
  0x34   : > { %883 = vmatpush1.bf16.msra.mxu0 %v3102_v38  ;;  %926 = vmatpush1.bf16.msra.mxu1 %v3107_v39 }
  0x35   : > { %884 = vmatprep.subr.bf16.mxu0 %v3114_v40  ;;  %927 = vmatprep.subr.bf16.mxu1 %v3121_v41 }
  0x37   : > { %2199 = vmatmul.mubr.msk.bf16.gmra.mrb[12].mxu0 %vm500_vm1, %v2649_v42  ;;  %2204 = vmatmul.mubr.msk.bf16.gmra.mrb[12].mxu1 %vm500_vm1, %v2649_v42 }
  0x38   : > { %885 = vmatpush1.bf16.msra.mxu0 %v3129_v43  ;;  %928 = vmatpush1.bf16.msra.mxu1 %v3134_v44 }
  0x39   : > { %886 = vmatprep.subr.bf16.mxu0 %v3139_v45  ;;  %929 = vmatprep.subr.bf16.mxu1 %v3144_v46 }
  0x3a   : > { %904 = vmatprep.mubr.bf16.mxu0 %v2854_v10  ;;  %947 = vmatprep.mubr.bf16.mxu1 %v2854_v10 }
  0x3c   : > { %887 = vmatpush1.bf16.msra.mxu0 %v3153_v47  ;;  %930 = vmatpush1.bf16.msra.mxu1 %v3158_v48 }
  0x3d   : > { %1025 = vmatprep.subr.bf16.mxu0 %v2954_v11  ;;  %1068 = vmatprep.subr.bf16.mxu1 %v2960_v12 }
  0x3f   : > { %905 = vmatmul.mubr.bf16.vlgmr.msra.gmra.mrb[0].mxu0 %v2854_v10  ;;  %948 = vmatmul.mubr.bf16.vlgmr.msra.gmra.mrb[0].mxu1 %v2854_v10 }
  0x40   : > { %1026 = vmatpush1.bf16.msra.mxu0 %v2972_v16  ;;  %1069 = vmatpush1.bf16.msra.mxu1 %v2977_v17 }
  0x41   : > { %1027 = vmatprep.subr.bf16.mxu0 %v2984_v18  ;;  %1070 = vmatprep.subr.bf16.mxu1 %v2989_v19 }
  0x42   : > { %1057 = vmatprep.mubr.bf16.mxu0 %v2854_v10  ;;  %1100 = vmatprep.mubr.bf16.mxu1 %v2854_v10 }
  0x44   : > { %1028 = vmatpush1.bf16.msra.mxu0 %v2996_v20  ;;  %1071 = vmatpush1.bf16.msra.mxu1 %v3003_v21 }
  0x45   : > { %1029 = vmatprep.subr.bf16.mxu0 %v3010_v22  ;;  %1072 = vmatprep.subr.bf16.mxu1 %v3018_v24 }
  0x48   : > { %1030 = vmatpush1.bf16.msra.mxu0 %v3023_v25  ;;  %1073 = vmatpush1.bf16.msra.mxu1 %v3030_v26 }
  0x49   : > { %1031 = vmatprep.subr.bf16.mxu0 %v3037_v27  ;;  %1074 = vmatprep.subr.bf16.mxu1 %v3042_v28 }
  0x4c   : > { %1032 = vmatpush1.bf16.msra.mxu0 %v3049_v29  ;;  %1075 = vmatpush1.bf16.msra.mxu1 %v3056_v30 }
  0x4d   : > { %1033 = vmatprep.subr.bf16.mxu0 %v3063_v31  ;;  %1076 = vmatprep.subr.bf16.mxu1 %v3068_v32 }
  0x50   : > { %1034 = vmatpush1.bf16.msra.mxu0 %v3076_v34  ;;  %1077 = vmatpush1.bf16.msra.mxu1 %v3081_v35 }
  0x51   : > { %1035 = vmatprep.subr.bf16.mxu0 %v3088_v36  ;;  %1078 = vmatprep.subr.bf16.mxu1 %v3095_v37 }
  0x54   : > { %1036 = vmatpush1.bf16.msra.mxu0 %v3102_v38  ;;  %1079 = vmatpush1.bf16.msra.mxu1 %v3107_v39 }
  0x55   : > { %1037 = vmatprep.subr.bf16.mxu0 %v3114_v40  ;;  %1080 = vmatprep.subr.bf16.mxu1 %v3121_v41 }
  0x58   : > { %1038 = vmatpush1.bf16.msra.mxu0 %v3129_v43  ;;  %1081 = vmatpush1.bf16.msra.mxu1 %v3134_v44 }
  0x59   : > { %1039 = vmatprep.subr.bf16.mxu0 %v3139_v45  ;;  %1082 = vmatprep.subr.bf16.mxu1 %v3144_v46 }
  0x5c   : > { %1040 = vmatpush1.bf16.msra.mxu0 %v3153_v47  ;;  %1083 = vmatpush1.bf16.msra.mxu1 %v3158_v48 }
  0x5d   : > { %1179 = vmatprep.subr.bf16.mxu0 %v2954_v11  ;;  %1222 = vmatprep.subr.bf16.mxu1 %v2960_v12 }
 0x112   : > { %v906_v56 = vpop.f32.mrb[0].mxu0  ;;  %v949_v58 = vpop.f32.mrb[0].mxu1 }
 0x113   : > { %v2515_v59 = vadd.f32 %v906_v56, %v3211_v54  ;;  %v908_v60 = vpop.f32.mrb[1].mxu0  ;;  %v951_v61 = vpop.f32.mrb[1].mxu1  ;;  %v2531_v15 = vadd.f32 %v949_v58, %v3218_v6 }
 0x114   : > { %v2516_v62 = vadd.f32 %v908_v60, %v3213_v55  ;;  %v910_v63 = vpop.f32.mrb[2].mxu0  ;;  %v953_v0 = vpop.f32.mrb[2].mxu1  ;;  %v2532_v33 = vadd.f32 %v951_v61, %v3221_v14 }
 0x115   : > { %v2237_v1 = vmul.f32 -1.442695, %v2515_v59  ;;  %v2517_v3 = vadd.f32 %v910_v63, %v3211_v54  ;;  %v912_v4 = vpop.f32.mrb[3].mxu0  ;;  %v955_v5 = vpop.f32.mrb[3].mxu1  ;;  %v2533_v23 = vadd.f32 %v953_v0, %v3218_v6  ;;  %v2239_v42 = vmul.f32 -1.442695, %v2531_v15 }
 0x116   : > { %v2238_v7 = vmul.f32 -1.442695, %v2516_v62  ;;  %v2518_v8 = vadd.f32 %v912_v4, %v3213_v55  ;;  %v2534_v51 = vadd.f32 %v955_v5, %v3221_v14 }
 0x117   : > { %2702 = vpow2.f32 %v2237_v1  ;;  %v2240_v9 = vmul.f32 -1.442695, %v2517_v3  ;;  %v2242_v49 = vmul.f32 -1.442695, %v2533_v23 }
 0x118   : > { %v2241_v13 = vmul.f32 -1.442695, %v2518_v8  ;;  %2704 = vpow2.f32 %v2238_v7 }
 0x119   : > { %2706 = vpow2.f32 %v2240_v9 }
 0x11a   : > { %2708 = vpow2.f32 %v2241_v13 }
 0x11b   : > { %2710 = vtanh.f32 %v2532_v33 }
 0x11c   : > { %2712 = vpow2.f32 %v2239_v42 }
 0x11d   : > { %2714 = vpow2.f32 %v2242_v49 }
 0x121   : > { %v2703_v50 = vpop.eup %2702 }
 0x122   : > { %v984_v53 = vadd.f32 1.0, %v2703_v50  ;;  %v2705_v56 = vpop.eup %2704 }
 0x123   : > { %v2707_v52 = vpop.eup %2706  ;;  %v985_v57 = vadd.f32 1.0, %v2705_v56 }
 0x124   : > { %2716 = vrcp.f32 %v984_v53  ;;  %v987_v58 = vadd.f32 1.0, %v2707_v52  ;;  %v2709_v59 = vpop.eup %2708 }
 0x125   : > { %2718 = vtanh.f32 %v2534_v51  ;;  %v988_v60 = vadd.f32 1.0, %v2709_v59  ;;  %v2711_v61 = vpop.eup %2710 }
 0x126   : > { %2720 = vrcp.f32 %v985_v57  ;;  %v2713_v62 = vpop.eup %2712 }
 0x127   : > { %2722 = vrcp.f32 %v987_v58  ;;  %v2715_v63 = vpop.eup %2714  ;;  %v986_v5 = vadd.f32 1.0, %v2713_v62 }
 0x128   : > { %2724 = vrcp.f32 %v988_v60  ;;  %v989_v15 = vadd.f32 1.0, %v2715_v63 }
 0x129   : > { %2726 = vrcp.f32 %v986_v5 }
 0x12e   : > { %v2717_v0 = vpop.eup %2716 }
 0x12f   : > { %v2719_v1 = vpop.eup %2718  ;;  %v1006_v2 = vmul.f32 %v2717_v0, %v2711_v61 }
 0x130   : > { %v2721_v3 = vpop.eup %2720 }
 0x131   : > { %v2723_v4 = vpop.eup %2722  ;;  %v1004_v7 = vmul.f32 0.0, %v2721_v3 }
 0x132   : > { %v1007_v8 = vmul.f32 %v2723_v4, %v2719_v1  ;;  %v2725_v9 = vpop.eup %2724 }
 0x133   : > { %v3227_v13 = vadd.f32 %v1006_v2, %v1004_v7  ;;  %v1005_v23 = vmul.f32 0.0, %v2725_v9  ;;  %v2727_v42 = vpop.eup %2726 }
 0x135   : > { %2728 = vtanh.f32 %v3227_v13  ;;  %v3230_v33 = vadd.f32 %v1007_v8, %v1005_v23 }
 0x136   : > { %2730 = vrcp.f32 %v989_v15 }
 0x137   : > { %2732 = vtanh.f32 %v3230_v33 }
 0x13f   : > { %v2729_v49 = vpop.eup %2728 }
 0x140   : > { %v2731_v50 = vpop.eup %2730  ;;  %v1012_v53 = vmul.f32 %v2729_v49, %v2727_v42 }
 0x141   : > { %v2733_v51 = vpop.eup %2732 }
 0x142   : > { %v1013_v56 = vmul.f32 %v2733_v51, %v2731_v50 }
 0x144   : > { %v3233_v52 = vpack.c.bf16 %v1013_v56, %v1012_v53 }
 0x146   : > { %1058 = vmatmul.mubr.bf16.vlgmr.msra.gmra.mrb[4].mxu0 %v3233_v52  ;;  %1101 = vmatmul.mubr.bf16.vlgmr.msra.gmra.mrb[4].mxu1 %v3233_v52 }
 0x147   : > { %1180 = vmatpush1.bf16.msra.mxu0 %v2972_v16  ;;  %1223 = vmatpush1.bf16.msra.mxu1 %v2977_v17 }
 0x148   : > { %1181 = vmatprep.subr.bf16.mxu0 %v2984_v18  ;;  %1224 = vmatprep.subr.bf16.mxu1 %v2989_v19 }
 0x149   : > { %1211 = vmatprep.mubr.bf16.mxu0 %v2854_v10  ;;  %1254 = vmatprep.mubr.bf16.mxu1 %v2854_v10 }
 0x14b   : > { %1182 = vmatpush1.bf16.msra.mxu0 %v2996_v20  ;;  %1225 = vmatpush1.bf16.msra.mxu1 %v3003_v21 }
 0x14c   : > { %1183 = vmatprep.subr.bf16.mxu0 %v3010_v22  ;;  %1226 = vmatprep.subr.bf16.mxu1 %v3018_v24 }
 0x14f   : > { %1184 = vmatpush1.bf16.msra.mxu0 %v3023_v25  ;;  %1227 = vmatpush1.bf16.msra.mxu1 %v3030_v26 }
 0x150   : > { %1185 = vmatprep.subr.bf16.mxu0 %v3037_v27  ;;  %1228 = vmatprep.subr.bf16.mxu1 %v3042_v28 }
 0x153   : > { %1186 = vmatpush1.bf16.msra.mxu0 %v3049_v29  ;;  %1229 = vmatpush1.bf16.msra.mxu1 %v3056_v30 }
 0x154   : > { %1187 = vmatprep.subr.bf16.mxu0 %v3063_v31  ;;  %1230 = vmatprep.subr.bf16.mxu1 %v3068_v32 }
 0x157   : > { %1188 = vmatpush1.bf16.msra.mxu0 %v3076_v34  ;;  %1231 = vmatpush1.bf16.msra.mxu1 %v3081_v35 }
 0x158   : > { %1189 = vmatprep.subr.bf16.mxu0 %v3088_v36  ;;  %1232 = vmatprep.subr.bf16.mxu1 %v3095_v37 }
 0x15b   : > { %1190 = vmatpush1.bf16.msra.mxu0 %v3102_v38  ;;  %1233 = vmatpush1.bf16.msra.mxu1 %v3107_v39 }
 0x15c   : > { %1191 = vmatprep.subr.bf16.mxu0 %v3114_v40  ;;  %1234 = vmatprep.subr.bf16.mxu1 %v3121_v41 }
 0x15f   : > { %1192 = vmatpush1.bf16.msra.mxu0 %v3129_v43  ;;  %1235 = vmatpush1.bf16.msra.mxu1 %v3134_v44 }
 0x160   : > { %1193 = vmatprep.subr.bf16.mxu0 %v3139_v45  ;;  %1236 = vmatprep.subr.bf16.mxu1 %v3144_v46 }
 0x163   : > { %1194 = vmatpush1.bf16.msra.mxu0 %v3153_v47  ;;  %1237 = vmatpush1.bf16.msra.mxu1 %v3158_v48 }
 0x164   : > { %1333 = vmatprep.subr.bf16.mxu0 %v2954_v11  ;;  %1376 = vmatprep.subr.bf16.mxu1 %v2960_v12 }
 0x219   : > { %v1059_v57 = vpop.f32.mrb[4].mxu0  ;;  %v1102_v58 = vpop.f32.mrb[4].mxu1 }
 0x21a   : > { %v2519_v59 = vadd.f32 %v1059_v57, %v3211_v54  ;;  %v1061_v60 = vpop.f32.mrb[5].mxu0  ;;  %v1104_v61 = vpop.f32.mrb[5].mxu1  ;;  %v2535_v8 = vadd.f32 %v1102_v58, %v3218_v6 }
 0x21b   : > { %v2520_v62 = vadd.f32 %v1061_v60, %v3213_v55  ;;  %v1063_v63 = vpop.f32.mrb[6].mxu0  ;;  %v1106_v0 = vpop.f32.mrb[6].mxu1  ;;  %v2536_v15 = vadd.f32 %v1104_v61, %v3221_v14 }
 0x21c   : > { %v2243_v1 = vmul.f32 -1.442695, %v2519_v59  ;;  %v2521_v2 = vadd.f32 %v1063_v63, %v3211_v54  ;;  %v1065_v3 = vpop.f32.mrb[7].mxu0  ;;  %v1108_v4 = vpop.f32.mrb[7].mxu1  ;;  %v2537_v9 = vadd.f32 %v1106_v0, %v3218_v6  ;;  %v2245_v23 = vmul.f32 -1.442695, %v2535_v8 }
 0x21d   : > { %v2244_v5 = vmul.f32 -1.442695, %v2520_v62  ;;  %v2522_v11 = vadd.f32 %v1065_v3, %v3213_v55  ;;  %v2538_v50 = vadd.f32 %v1108_v4, %v3221_v14 }
 0x21e   : > { %2734 = vpow2.f32 %v2243_v1  ;;  %v2246_v12 = vmul.f32 -1.442695, %v2521_v2  ;;  %v2248_v42 = vmul.f32 -1.442695, %v2537_v9 }
 0x21f   : > { %v2247_v7 = vmul.f32 -1.442695, %v2522_v11  ;;  %2736 = vpow2.f32 %v2244_v5 }
 0x220   : > { %2738 = vpow2.f32 %v2246_v12 }
 0x221   : > { %2740 = vpow2.f32 %v2247_v7 }
 0x222   : > { %2742 = vtanh.f32 %v2536_v15 }
 0x223   : > { %2744 = vpow2.f32 %v2245_v23 }
 0x224   : > { %2746 = vpow2.f32 %v2248_v42 }
 0x228   : > { %v2735_v49 = vpop.eup %2734 }
 0x229   : > { %v1137_v51 = vadd.f32 1.0, %v2735_v49  ;;  %v2737_v53 = vpop.eup %2736 }
 0x22a   : > { %v2739_v56 = vpop.eup %2738  ;;  %v1138_v57 = vadd.f32 1.0, %v2737_v53 }
 0x22b   : > { %2748 = vrcp.f32 %v1137_v51  ;;  %v1140_v58 = vadd.f32 1.0, %v2739_v56  ;;  %v2741_v59 = vpop.eup %2740 }
 0x22c   : > { %2750 = vtanh.f32 %v2538_v50  ;;  %v1141_v60 = vadd.f32 1.0, %v2741_v59  ;;  %v2743_v61 = vpop.eup %2742 }
 0x22d   : > { %2752 = vrcp.f32 %v1138_v57  ;;  %v2745_v62 = vpop.eup %2744 }
 0x22e   : > { %2754 = vrcp.f32 %v1140_v58  ;;  %v2747_v63 = vpop.eup %2746  ;;  %v1139_v5 = vadd.f32 1.0, %v2745_v62 }
 0x22f   : > { %2756 = vrcp.f32 %v1141_v60  ;;  %v1142_v9 = vadd.f32 1.0, %v2747_v63 }
 0x230   : > { %2758 = vrcp.f32 %v1139_v5 }
 0x235   : > { %v2749_v0 = vpop.eup %2748 }
 0x236   : > { %v2751_v1 = vpop.eup %2750  ;;  %v1159_v2 = vmul.f32 %v2749_v0, %v2743_v61 }
 0x237   : > { %v2753_v3 = vpop.eup %2752 }
 0x238   : > { %v2755_v4 = vpop.eup %2754  ;;  %v1157_v11 = vmul.f32 %v2753_v3, %v3227_v13 }
 0x239   : > { %v1160_v12 = vmul.f32 %v2755_v4, %v2751_v1  ;;  %v2757_v7 = vpop.eup %2756 }
 0x23a   : > { %v3280_v8 = vadd.f32 %v1159_v2, %v1157_v11  ;;  %v1158_v15 = vmul.f32 %v2757_v7, %v3230_v33  ;;  %v2759_v42 = vpop.eup %2758 }
 0x23c   : > { %2760 = vtanh.f32 %v3280_v8  ;;  %v3284_v23 = vadd.f32 %v1160_v12, %v1158_v15 }
 0x23d   : > { %2762 = vrcp.f32 %v1142_v9 }
 0x23e   : > { %2764 = vtanh.f32 %v3284_v23 }
 0x246   : > { %v2761_v49 = vpop.eup %2760 }
 0x247   : > { %v2763_v50 = vpop.eup %2762  ;;  %v1165_v13 = vmul.f32 %v2761_v49, %v2759_v42 }
 0x248   : > { %v2765_v51 = vpop.eup %2764 }
 0x249   : > { %v1166_v53 = vmul.f32 %v2765_v51, %v2763_v50  ;;  %v2662_v50 = vld [vmem:[%s3560_s4 + $0x40] sm:$0xff]  }
 0x24b   : > { %v3287_v56 = vpack.c.bf16 %v1166_v53, %v1165_v13  ;;  %v2664_v13 = vld [vmem:[%s3560_s4 + $0x48] sm:$0xff]  }
 0x24c   : > { %v2665_v53 = vld [vmem:[%s3560_s4 + $0x8] sm:$0xff]  }
 0x24d   : > { %1212 = vmatmul.mubr.bf16.vlgmr.msra.gmra.mrb[8].mxu0 %v3287_v56  ;;  %1255 = vmatmul.mubr.bf16.vlgmr.msra.gmra.mrb[8].mxu1 %v3287_v56 }
 0x24e   : > { %1334 = vmatpush1.bf16.msra.mxu0 %v2972_v16  ;;  %1377 = vmatpush1.bf16.msra.mxu1 %v2977_v17 }
 0x24f   : > { %1335 = vmatprep.subr.bf16.mxu0 %v2984_v18  ;;  %1378 = vmatprep.subr.bf16.mxu1 %v2989_v19 }
 0x250   : > { %1365 = vmatprep.mubr.bf16.mxu0 %v2854_v10  ;;  %1408 = vmatprep.mubr.bf16.mxu1 %v2854_v10  ;;  %v2855_v10 = vmov 0.0  }
 0x252   : > { %1336 = vmatpush1.bf16.msra.mxu0 %v2996_v20  ;;  %1379 = vmatpush1.bf16.msra.mxu1 %v3003_v21 }
 0x253   : > { %1337 = vmatprep.subr.bf16.mxu0 %v3010_v22  ;;  %1380 = vmatprep.subr.bf16.mxu1 %v3018_v24 }
 0x256   : > { %1338 = vmatpush1.bf16.msra.mxu0 %v3023_v25  ;;  %1381 = vmatpush1.bf16.msra.mxu1 %v3030_v26 }
 0x257   : > { %1339 = vmatprep.subr.bf16.mxu0 %v3037_v27  ;;  %1382 = vmatprep.subr.bf16.mxu1 %v3042_v28 }
 0x25a   : > { %1340 = vmatpush1.bf16.msra.mxu0 %v3049_v29  ;;  %1383 = vmatpush1.bf16.msra.mxu1 %v3056_v30 }
 0x25b   : > { %1341 = vmatprep.subr.bf16.mxu0 %v3063_v31  ;;  %1384 = vmatprep.subr.bf16.mxu1 %v3068_v32 }
 0x25e   : > { %1342 = vmatpush1.bf16.msra.mxu0 %v3076_v34  ;;  %1385 = vmatpush1.bf16.msra.mxu1 %v3081_v35 }
 0x25f   : > { %1343 = vmatprep.subr.bf16.mxu0 %v3088_v36  ;;  %1386 = vmatprep.subr.bf16.mxu1 %v3095_v37 }
 0x262   : > { %1344 = vmatpush1.bf16.msra.mxu0 %v3102_v38  ;;  %1387 = vmatpush1.bf16.msra.mxu1 %v3107_v39 }
 0x263   : > { %1345 = vmatprep.subr.bf16.mxu0 %v3114_v40  ;;  %1388 = vmatprep.subr.bf16.mxu1 %v3121_v41 }
 0x266   : > { %1346 = vmatpush1.bf16.msra.mxu0 %v3129_v43  ;;  %1389 = vmatpush1.bf16.msra.mxu1 %v3134_v44 }
 0x267   : > { %1347 = vmatprep.subr.bf16.mxu0 %v3139_v45  ;;  %1390 = vmatprep.subr.bf16.mxu1 %v3144_v46 }
 0x26a   : > { %1348 = vmatpush1.bf16.msra.mxu0 %v3153_v47  ;;  %1391 = vmatpush1.bf16.msra.mxu1 %v3158_v48 }
 0x26b   : > { %2404 = vmatprep.subr.bf16.mxu0 %v2855_v10  ;;  %2424 = vmatprep.subr.bf16.mxu1 %v2855_v10 }
 0x320   : > { %v1213_v16 = vpop.f32.mrb[8].mxu0  ;;  %v1256_v17 = vpop.f32.mrb[8].mxu1 }
 0x321   : > { %v2523_v18 = vadd.f32 %v1213_v16, %v3211_v54  ;;  %v1215_v19 = vpop.f32.mrb[9].mxu0  ;;  %v1258_v20 = vpop.f32.mrb[9].mxu1  ;;  %v2539_v34 = vadd.f32 %v1256_v17, %v3218_v6  ;;  %v2666_v16 = vld [vmem:[%s3560_s4 + $0x50] sm:$0xff]  }
 0x322   : > { %v2524_v21 = vadd.f32 %v1215_v19, %v3213_v55  ;;  %v1217_v22 = vpop.f32.mrb[10].mxu0  ;;  %v1260_v24 = vpop.f32.mrb[10].mxu1  ;;  %v2540_v36 = vadd.f32 %v1258_v20, %v3221_v14  ;;  %v2667_v17 = vld [vmem:[%s3560_s4 + $0x10] sm:$0xff]   ;;  %v2669_v19 = vld [vmem:[%s3560_s4 + $0x18] sm:$0xff]   ;;  %v2670_v20 = vld [vmem:[%s3560_s4 + $0x60] sm:$0xff]  }
 0x323   : > { %v2249_v25 = vmul.f32 -1.442695, %v2523_v18  ;;  %v2525_v26 = vadd.f32 %v1217_v22, %v3211_v54  ;;  %v1219_v27 = vpop.f32.mrb[11].mxu0  ;;  %v1262_v28 = vpop.f32.mrb[11].mxu1  ;;  %v2541_v35 = vadd.f32 %v1260_v24, %v3218_v6  ;;  %v2251_v37 = vmul.f32 -1.442695, %v2539_v34 }
 0x324   : > { %v2250_v29 = vmul.f32 -1.442695, %v2524_v21  ;;  %v2526_v30 = vadd.f32 %v1219_v27, %v3213_v55  ;;  %v2542_v40 = vadd.f32 %v1262_v28, %v3221_v14  ;;  %v2668_v18 = vld [vmem:[%s3560_s4 + $0x58] sm:$0xff]   ;;  %v2671_v21 = vld [vmem:[%s3560_s4 + $0x20] sm:$0xff]   ;;  %v2672_v22 = vld [vmem:[%s3560_s4 + $0x68] sm:$0xff]  }
 0x325   : > { %2766 = vpow2.f32 %v2249_v25  ;;  %v2252_v31 = vmul.f32 -1.442695, %v2525_v26  ;;  %v2254_v38 = vmul.f32 -1.442695, %v2541_v35  ;;  %v2673_v24 = vld [vmem:[%s3560_s4 + $0x28] sm:$0xff]   ;;  %v2674_v25 = vld [vmem:[%s3560_s4 + $0x70] sm:$0xff]  }
 0x326   : > { %v2253_v32 = vmul.f32 -1.442695, %v2526_v30  ;;  %2768 = vpow2.f32 %v2250_v29  ;;  %v2675_v26 = vld [vmem:[%s3560_s4 + $0x30] sm:$0xff]   ;;  %v2676_v27 = vld [vmem:[%s3560_s4 + $0x78] sm:$0xff]   ;;  %v2678_v29 = vld [vmem:[%s3560_s4 + $0x80] sm:$0xff]  }
 0x327   : > { %2770 = vpow2.f32 %v2252_v31  ;;  %v2677_v28 = vld [vmem:[%s3560_s4 + $0x38] sm:$0xff]   ;;  %v2679_v30 = vld [vmem:[%s3560_s4 + $0x88] sm:$0xff]   ;;  %v2682_v31 = vld [vmem:[%s3560_s4 + $0xa0] sm:$0xff]  }
 0x328   : > { %2772 = vpow2.f32 %v2253_v32  ;;  %v2683_v32 = vld [vmem:[%s3560_s4 + $0xa8] sm:$0xff]   ;;  %v2684_v34 = vld [vmem:[%s3560_s4 + $0xb0] sm:$0xff]   ;;  %v2685_v35 = vld [vmem:[%s3560_s4 + $0xb8] sm:$0xff]  }
 0x329   : > { %2774 = vtanh.f32 %v2540_v36  ;;  %v2686_v36 = vld [vmem:[%s3560_s4 + $0xc0] sm:$0xff]  }
 0x32a   : > { %2776 = vpow2.f32 %v2251_v37  ;;  %v2687_v37 = vld [vmem:[%s3560_s4 + $0xc8] sm:$0xff]  }
 0x32b   : > { %2778 = vpow2.f32 %v2254_v38  ;;  %v2688_v38 = vld [vmem:[%s3560_s4 + $0xd0] sm:$0xff]  }
 0x32f   : > { %v2767_v39 = vpop.eup %2766 }
 0x330   : > { %v1291_v41 = vadd.f32 1.0, %v2767_v39  ;;  %v2769_v43 = vpop.eup %2768  ;;  %v2689_v39 = vld [vmem:[%s3560_s4 + $0xd8] sm:$0xff]  }
 0x331   : > { %v2771_v44 = vpop.eup %2770  ;;  %v1292_v45 = vadd.f32 1.0, %v2769_v43  ;;  %v2692_v43 = vld [vmem:[%s3560_s4 + $0xf0] sm:$0xff]  }
 0x332   : > { %2780 = vrcp.f32 %v1291_v41  ;;  %v1294_v46 = vadd.f32 1.0, %v2771_v44  ;;  %v2773_v47 = vpop.eup %2772  ;;  %v2691_v41 = vld [vmem:[%s3560_s4 + $0xe8] sm:$0xff]   ;;  %v2693_v44 = vld [vmem:[%s3560_s4 + $0xf8] sm:$0xff]  }
 0x333   : > { %2782 = vtanh.f32 %v2542_v40  ;;  %v1295_v48 = vadd.f32 1.0, %v2773_v47  ;;  %v2775_v33 = vpop.eup %2774  ;;  %v2690_v40 = vld [vmem:[%s3560_s4 + $0xe0] sm:$0xff]   ;;  %v2696_v47 = vld [vmem:[%s3562_s6 + $0x10] sm:$0xff]  }
 0x334   : > { %2784 = vrcp.f32 %v1292_v45  ;;  %v2777_v57 = vpop.eup %2776  ;;  %v2694_v45 = vld [vmem:[%s3562_s6] sm:$0xff]  }
 0x335   : > { %2786 = vrcp.f32 %v1294_v46  ;;  %v2779_v58 = vpop.eup %2778  ;;  %v1293_v0 = vadd.f32 1.0, %v2777_v57  ;;  %v2695_v46 = vld [vmem:[%s3562_s6 + $0x8] sm:$0xff]  }
 0x336   : > { %2788 = vrcp.f32 %v1295_v48  ;;  %v1296_v5 = vadd.f32 1.0, %v2779_v58  ;;  %v2697_v48 = vld [vmem:[%s3562_s6 + $0x18] sm:$0xff]   ;;  %v2699_v57 = vld [vmem:[%s3562_s6 + $0x28] sm:$0xff]  }
 0x337   : > { %2790 = vrcp.f32 %v1293_v0 }
 0x33c   : > { %v2781_v59 = vpop.eup %2780 }
 0x33d   : > { %v2783_v60 = vpop.eup %2782  ;;  %v1313_v61 = vmul.f32 %v2781_v59, %v2775_v33  ;;  %v2698_v33 = vld [vmem:[%s3562_s6 + $0x20] sm:$0xff]  }
 0x33e   : > { %v2785_v62 = vpop.eup %2784 }
 0x33f   : > { %v2787_v63 = vpop.eup %2786  ;;  %v1311_v1 = vmul.f32 %v2785_v62, %v3280_v8 }
 0x340   : > { %v1314_v2 = vmul.f32 %v2787_v63, %v2783_v60  ;;  %v2789_v3 = vpop.eup %2788 }
 0x341   : > { %v3334_v4 = vadd.f32 %v1313_v61, %v1311_v1  ;;  %v1312_v11 = vmul.f32 %v2789_v3, %v3284_v23  ;;  %v2791_v7 = vpop.eup %2790  ;;  %v2663_v23 = vld [vmem:[%s3560_s4] sm:$0xff]  }
 0x343   : > { %2792 = vtanh.f32 %v3334_v4  ;;  %v3338_v12 = vadd.f32 %v1314_v2, %v1312_v11 }
 0x344   : > { %2794 = vrcp.f32 %v1296_v5 }
 0x345   : > { %2796 = vtanh.f32 %v3338_v12 }
 0x34d   : > { %v2793_v9 = vpop.eup %2792 }
 0x34e   : > { %v2795_v15 = vpop.eup %2794  ;;  %v1319_v8 = vmul.f32 %v2793_v9, %v2791_v7 }
 0x34f   : > { %v2797_v42 = vpop.eup %2796 }
 0x350   : > { %v1320_v49 = vmul.f32 %v2797_v42, %v2795_v15 }
 0x352   : > { %v3347_v51 = vpack.c.bf16 %v1320_v49, %v1319_v8 }
 0x354   : > { %1366 = vmatmul.mubr.bf16.vlgmr.msra.gmra.mrb[12].mxu0 %v3347_v51  ;;  %1409 = vmatmul.mubr.bf16.vlgmr.msra.gmra.mrb[12].mxu1 %v3347_v51 }
 0x355   : > { %2405 = vmatpush3.bf16.msra.mxu0 %v2662_v50  ;;  %2425 = vmatpush3.bf16.msra.mxu1 %v2663_v23 }
 0x356   : > { %2406 = vmatprep.subr.bf16.mxu0 %v2855_v10  ;;  %2426 = vmatprep.subr.bf16.mxu1 %v2855_v10 }
 0x357   : > { %2420 = vmatprep.mubr.msk.bf16.mxu0 %vm2856_vm2, %v2855_v10  ;;  %2440 = vmatprep.mubr.msk.bf16.mxu1 %vm2856_vm2, %v2855_v10 }
 0x359   : > { %2407 = vmatpush3.bf16.msra.mxu0 %v2664_v13  ;;  %2427 = vmatpush3.bf16.msra.mxu1 %v2665_v53 }
 0x35a   : > { %2408 = vmatprep.subr.bf16.mxu0 %v2855_v10  ;;  %2428 = vmatprep.subr.bf16.mxu1 %v2855_v10 }
 0x35d   : > { %2409 = vmatpush3.bf16.msra.mxu0 %v2666_v16  ;;  %2429 = vmatpush3.bf16.msra.mxu1 %v2667_v17 }
 0x35e   : > { %2410 = vmatprep.subr.bf16.mxu0 %v2855_v10  ;;  %2430 = vmatprep.subr.bf16.mxu1 %v2855_v10 }
 0x361   : > { %2411 = vmatpush3.bf16.msra.mxu0 %v2668_v18  ;;  %2431 = vmatpush3.bf16.msra.mxu1 %v2669_v19 }
 0x362   : > { %2412 = vmatprep.subr.bf16.mxu0 %v2855_v10  ;;  %2432 = vmatprep.subr.bf16.mxu1 %v2855_v10 }
 0x365   : > { %2413 = vmatpush3.bf16.msra.mxu0 %v2670_v20  ;;  %2433 = vmatpush3.bf16.msra.mxu1 %v2671_v21 }
 0x366   : > { %2414 = vmatprep.subr.bf16.mxu0 %v2855_v10  ;;  %2434 = vmatprep.subr.bf16.mxu1 %v2855_v10 }
 0x369   : > { %2415 = vmatpush3.bf16.msra.mxu0 %v2672_v22  ;;  %2435 = vmatpush3.bf16.msra.mxu1 %v2673_v24 }
 0x36a   : > { %2416 = vmatprep.subr.bf16.mxu0 %v2855_v10  ;;  %2436 = vmatprep.subr.bf16.mxu1 %v2855_v10 }
 0x36d   : > { %2417 = vmatpush3.bf16.msra.mxu0 %v2674_v25  ;;  %2437 = vmatpush3.bf16.msra.mxu1 %v2675_v26 }
 0x36e   : > { %2418 = vmatprep.subr.bf16.mxu0 %v2855_v10  ;;  %2438 = vmatprep.subr.bf16.mxu1 %v2855_v10 }
 0x371   : > { %2419 = vmatpush3.bf16.msra.mxu0 %v2676_v27  ;;  %2439 = vmatpush3.bf16.msra.mxu1 %v2677_v28 }
 0x372   : > { %2444 = vmatprep.subr.bf16.mxu0 %v2855_v10  ;;  %2464 = vmatprep.subr.bf16.mxu1 %v2855_v10 }
 0x374   : > { %2421 = vmatmul.mubr.bf16.vlgmr.msra.gmra.mrb[16].mxu0 %v3287_v56  ;;  %2441 = vmatmul.mubr.bf16.vlgmr.msra.gmra.mrb[16].mxu1 %v3233_v52  ;;  %v2680_v56 = vld [vmem:[%s3560_s4 + $0x90] sm:$0xff]   ;;  %v2681_v52 = vld [vmem:[%s3560_s4 + $0x98] sm:$0xff]  }
 0x375   : > { %2445 = vmatpush3.bf16.msra.mxu0 %v2678_v29  ;;  %2460 = vmatprep.mubr.msk.bf16.mxu0 %vm2856_vm2, %v2855_v10 }
 0x376   : > { %2446 = vmatprep.subr.bf16.mxu0 %v2855_v10  ;;  %2480 = vmatprep.mubr.msk.bf16.mxu1 %vm2856_vm2, %v2855_v10 }
 0x377   : > { %2465 = vmatpush3.bf16.msra.mxu1 %v2686_v36 }
 0x378   : > { %2466 = vmatprep.subr.bf16.mxu1 %v2855_v10 }
 0x379   : > { %2447 = vmatpush3.bf16.msra.mxu0 %v2679_v30 }
 0x37a   : > { %2448 = vmatprep.subr.bf16.mxu0 %v2855_v10 }
 0x37b   : > { %2467 = vmatpush3.bf16.msra.mxu1 %v2687_v37 }
 0x37c   : > { %2468 = vmatprep.subr.bf16.mxu1 %v2855_v10 }
 0x37d   : > { %2449 = vmatpush3.bf16.msra.mxu0 %v2680_v56 }
 0x37e   : > { %2450 = vmatprep.subr.bf16.mxu0 %v2855_v10 }
 0x37f   : > { %2469 = vmatpush3.bf16.msra.mxu1 %v2688_v38 }
 0x380   : > { %2470 = vmatprep.subr.bf16.mxu1 %v2855_v10 }
 0x381   : > { %2451 = vmatpush3.bf16.msra.mxu0 %v2681_v52 }
 0x382   : > { %2452 = vmatprep.subr.bf16.mxu0 %v2855_v10 }
 0x383   : > { %2471 = vmatpush3.bf16.msra.mxu1 %v2689_v39 }
 0x384   : > { %2472 = vmatprep.subr.bf16.mxu1 %v2855_v10 }
 0x385   : > { %2453 = vmatpush3.bf16.msra.mxu0 %v2682_v31 }
 0x386   : > { %2454 = vmatprep.subr.bf16.mxu0 %v2855_v10 }
 0x387   : > { %2473 = vmatpush3.bf16.msra.mxu1 %v2690_v40 }
 0x388   : > { %2474 = vmatprep.subr.bf16.mxu1 %v2855_v10 }
 0x389   : > { %2455 = vmatpush3.bf16.msra.mxu0 %v2683_v32 }
 0x38a   : > { %2456 = vmatprep.subr.bf16.mxu0 %v2855_v10 }
 0x38b   : > { %2475 = vmatpush3.bf16.msra.mxu1 %v2691_v41 }
 0x38c   : > { %2476 = vmatprep.subr.bf16.mxu1 %v2855_v10 }
 0x38d   : > { %2457 = vmatpush3.bf16.msra.mxu0 %v2684_v34 }
 0x38e   : > { %2458 = vmatprep.subr.bf16.mxu0 %v2855_v10 }
 0x38f   : > { %2477 = vmatpush3.bf16.msra.mxu1 %v2692_v43 }
 0x390   : > { %2478 = vmatprep.subr.bf16.mxu1 %v2855_v10 }
 0x391   : > { %2459 = vmatpush3.bf16.msra.mxu0 %v2685_v35 }
 0x392   : > { %2484 = vmatprep.subr.bf16.mxu0 %v2855_v10 }
 0x393   : > { %2479 = vmatpush3.bf16.msra.mxu1 %v2693_v44 }
 0x394   : > { %2461 = vmatmul.mubr.bf16.vlgmr.msra.gmra.mrb[20].mxu0 %v3347_v51 }
 0x395   : > { %2500 = vmatprep.mubr.msk.bf16.mxu0 %vm2856_vm2, %v2855_v10  ;;  %2485 = vmatpush3.bf16.msra.mxu0 %v2694_v45 }
 0x396   : > { %2486 = vmatprep.subr.bf16.mxu0 %v2855_v10 }
 0x399   : > { %2487 = vmatpush3.bf16.msra.mxu0 %v2695_v46 }
 0x39a   : > { %2488 = vmatprep.subr.bf16.mxu0 %v2855_v10 }
 0x39d   : > { %2489 = vmatpush3.bf16.msra.mxu0 %v2696_v47 }
 0x39e   : > { %2490 = vmatprep.subr.bf16.mxu0 %v2855_v10 }
 0x3a1   : > { %2491 = vmatpush3.bf16.msra.mxu0 %v2697_v48 }
 0x3a2   : > { %2492 = vmatprep.subr.bf16.mxu0 %v2855_v10 }
 0x3a5   : > { %2493 = vmatpush3.bf16.msra.mxu0 %v2698_v33 }
 0x3a6   : > { %2494 = vmatprep.subr.bf16.mxu0 %v2855_v10 }
 0x3a9   : > { %2495 = vmatpush3.bf16.msra.mxu0 %v2699_v57 }
 0x3aa   : > { %2496 = vmatprep.subr.bf16.mxu0 %v2855_v10 }
 0x427   : > { %v1367_v58 = vpop.f32.mrb[12].mxu0  ;;  %v1410_v59 = vpop.f32.mrb[12].mxu1 }
 0x428   : > { %v2527_v60 = vadd.f32 %v1367_v58, %v3211_v54  ;;  %v1369_v61 = vpop.f32.mrb[13].mxu0  ;;  %v1412_v62 = vpop.f32.mrb[13].mxu1  ;;  %v2543_v8 = vadd.f32 %v1410_v59, %v3218_v6 }
 0x429   : > { %v2528_v63 = vadd.f32 %v1369_v61, %v3213_v55  ;;  %v1371_v0 = vpop.f32.mrb[14].mxu0  ;;  %v1414_v1 = vpop.f32.mrb[14].mxu1  ;;  %v2544_v50 = vadd.f32 %v1412_v62, %v3221_v14 }
 0x42a   : > { %v2255_v2 = vmul.f32 -1.442695, %v2527_v60  ;;  %v2529_v3 = vadd.f32 %v1371_v0, %v3211_v54  ;;  %v1373_v5 = vpop.f32.mrb[15].mxu0  ;;  %v1416_v11 = vpop.f32.mrb[15].mxu1  ;;  %v2545_v49 = vadd.f32 %v1414_v1, %v3218_v6  ;;  %v2257_v23 = vmul.f32 -1.442695, %v2543_v8 }
 0x42b   : > { %v2256_v7 = vmul.f32 -1.442695, %v2528_v63  ;;  %v2530_v9 = vadd.f32 %v1373_v5, %v3213_v55  ;;  %v2546_v13 = vadd.f32 %v1416_v11, %v3221_v14  ;;  %v2700_v0 = vld [vmem:[%s3562_s6 + $0x30] sm:$0xff]   ;;  %v2701_v1 = vld [vmem:[%s3562_s6 + $0x38] sm:$0xff]   ;;  %v2341_v11 = vld [vmem:[%s3561_s5] ss:$0 sm:$0xff] }
 0x42c   : > { %2798 = vpow2.f32 %v2255_v2  ;;  %v2258_v15 = vmul.f32 -1.442695, %v2529_v3  ;;  %v2260_v51 = vmul.f32 -1.442695, %v2545_v49  ;;  %2497 = vmatpush3.bf16.msra.mxu0 %v2700_v0 }
 0x42d   : > { %v2259_v42 = vmul.f32 -1.442695, %v2530_v9  ;;  %2800 = vpow2.f32 %v2256_v7  ;;  %2498 = vmatprep.subr.bf16.mxu0 %v2855_v10  ;;  %v2024_v10 = vld [vmem:[%s3563_s7] sm:$0xff] }
 0x42e   : > { %2802 = vpow2.f32 %v2258_v15 }
 0x42f   : > { %2804 = vpow2.f32 %v2259_v42 }
 0x430   : > { %2806 = vtanh.f32 %v2544_v50  ;;  %2499 = vmatpush3.bf16.msra.mxu0 %v2701_v1 }
 0x431   : > { %2808 = vpow2.f32 %v2257_v23 }
 0x432   : > { %2810 = vpow2.f32 %v2260_v51 }
 0x436   : > { %v2799_v54 = vpop.eup %2798 }
 0x437   : > { %v1445_v53 = vadd.f32 1.0, %v2799_v54  ;;  %v2801_v55 = vpop.eup %2800 }
 0x438   : > { %v2803_v16 = vpop.eup %2802  ;;  %v1446_v17 = vadd.f32 1.0, %v2801_v55  ;;  %v2027_v55 = vld [vmem:[%s3564_s8 + $0x8] sm:$0xff] }
 0x439   : > { %2812 = vrcp.f32 %v1445_v53  ;;  %v1448_v18 = vadd.f32 1.0, %v2803_v16  ;;  %v2805_v19 = vpop.eup %2804  ;;  %v2025_v53 = vld [vmem:[%s3563_s7 + $0x8] sm:$0xff]  ;;  %v2026_v16 = vld [vmem:[%s3564_s8] sm:$0xff] }
 0x43a   : > { %2814 = vtanh.f32 %v2546_v13  ;;  %v1449_v6 = vadd.f32 1.0, %v2805_v19  ;;  %v2807_v20 = vpop.eup %2806 }
 0x43b   : > { %2816 = vrcp.f32 %v1446_v17  ;;  %v2809_v21 = vpop.eup %2808 }
 0x43c   : > { %2818 = vrcp.f32 %v1448_v18  ;;  %v2811_v22 = vpop.eup %2810  ;;  %v1447_v27 = vadd.f32 1.0, %v2809_v21 }
 0x43d   : > { %2820 = vrcp.f32 %v1449_v6  ;;  %v1450_v34 = vadd.f32 1.0, %v2811_v22 }
 0x43e   : > { %2822 = vrcp.f32 %v1447_v27 }
 0x443   : > { %v2813_v24 = vpop.eup %2812 }
 0x444   : > { %v2815_v25 = vpop.eup %2814  ;;  %v1467_v14 = vmul.f32 %v2813_v24, %v2807_v20 }
 0x445   : > { %v2817_v26 = vpop.eup %2816 }
 0x446   : > { %v2819_v28 = vpop.eup %2818  ;;  %v1465_v29 = vmul.f32 %v2817_v26, %v3334_v4 }
 0x447   : > { %v1468_v30 = vmul.f32 %v2819_v28, %v2815_v25  ;;  %v1595_v56 = vpop.f32.mrb[16].mxu0  ;;  %v1684_v52 = vpop.f32.mrb[16].mxu1 }
 0x448   : > { %v2821_v31 = vpop.eup %2820  ;;  %v1469_v32 = vadd.f32 %v1467_v14, %v1465_v29  ;;  %v1685_v35 = vadd.f32 %v1684_v52, %v1595_v56  ;;  %v2422_v36 = vpop.f32.mrb[17].mxu0 }
 0x449   : > { %v2442_v37 = vpop.f32.mrb[17].mxu1  ;;  %v1466_v38 = vmul.f32 %v2821_v31, %v3338_v12  ;;  %v1598_v39 = vpop.f32.mrb[18].mxu0 }
 0x44a   : > { %v1687_v40 = vpop.f32.mrb[18].mxu1  ;;  %2824 = vtanh.f32 %v1469_v32  ;;  %v2423_v43 = vpop.f32.mrb[19].mxu0 }
 0x44b   : > { %v1688_v41 = vadd.f32 %v1687_v40, %v1598_v39  ;;  %v2443_v44 = vpop.f32.mrb[19].mxu1  ;;  %v1470_v45 = vadd.f32 %v1468_v30, %v1466_v38  ;;  %2826 = vrcp.f32 %v1450_v34  ;;  %v2823_v4 = vpop.eup %2822 }
 0x44d   : > { %2828 = vtanh.f32 %v1470_v45 }
 0x454   : > { %v2825_v46 = vpop.eup %2824 }
 0x455   : > { %v1473_v47 = vmul.f32 %v2825_v46, %v2823_v4  ;;  %v2827_v48 = vpop.eup %2826 }
 0x457   : > { %v2829_v33 = vpop.eup %2828 }
 0x458   : > { %v1474_v57 = vmul.f32 %v2829_v33, %v2827_v48 }
 0x45a   : > { %v1475_v58 = vpack.c.bf16 %v1474_v57, %v1473_v47 }
 0x45c   : > { %2481 = vmatmul.mubr.bf16.vlgmr.msra.gmra.mrb[20].mxu1 %v1475_v58 }
 0x45d   : > { %2508 = vmatprep.mubr.msk.f32.mxu1 %vm2028_vm3, %v2024_v10 }
 0x467   : > { %v1791_v59 = vpop.f32.mrb[20].mxu0 }
 0x468   : > { %v1798_v60 = vadd.f32 %v1791_v59, %v1685_v35  ;;  %v2462_v12 = vpop.f32.mrb[21].mxu0 }
 0x469   : > { %v1794_v61 = vpop.f32.mrb[22].mxu0 }
 0x46a   : > { %v1799_v62 = vadd.f32 %v1794_v61, %v1688_v41  ;;  %v2463_v63 = vpop.f32.mrb[23].mxu0 }
 0x52f   : > { %v1900_v2 = vpop.f32.mrb[20].mxu1 }
 0x530   : > { %v1907_v3 = vadd.f32 %v1900_v2, %v1798_v60  ;;  %v2482_v5 = vpop.f32.mrb[21].mxu1 }
 0x531   : > { %v1903_v7 = vpop.f32.mrb[22].mxu1 }
 0x532   : > { %v1908_v9 = vadd.f32 %v1903_v7, %v1799_v62  ;;  %v2483_v15 = vpop.f32.mrb[23].mxu1  ;;  %v1916_v42 = vadd.f32 %v2341_v11, %v1907_v3 }
 0x534   : > { %v1917_v8 = vadd.f32 %v2341_v11, %v1908_v9 }
 0x536   : > { %v1918_v49 = vpack.c.bf16 %v1917_v8, %v1916_v42 }
 0x538   : > { %2501 = vmatmul.mubr.bf16.vlgmr.msra.gmra.mrb[24].mxu0 %v1918_v49 }
 0x60b   : > { %v2017_v50 = vpop.f32.mrb[24].mxu0 }
 0x60c   : > { %v2502_v23 = vpop.f32.mrb[25].mxu0 }
 0x60d   : > { %v2020_v51 = vpop.f32.mrb[26].mxu0 }
 0x60e   : > { %v2511_v54 = vpack.c.bf16 %v2020_v51, %v2017_v50  ;;  %v2503_v13 = vpop.f32.mrb[27].mxu0 }
 0x610   : > { %2512 = vmatprep.subr.bf16.mxu1 %v2511_v54 }
 0x611   : > { %2514 = vmatpush3.bf16.msra.mxu1 %v2511_v54 }
 0x614   : > { %2509 = vmatmul.mubr.msk.f32.vlgmr.msra.gmra.mrb[24].mxu1 %vm2028_vm3, %v2025_v53 }
 0x6e7   : > { %v2510_v17 = vpop.f32.mrb[24].mxu1 }
 0x6e8   : > { %v2107_v18 = vadd.f32 %v2510_v17, %v2027_v55  ;;  %v2101_v19 = vpop.f32.mrb[25].mxu1 }
 0x6e9   : > { %v2102_v6 = vadd.f32 %v2101_v19, %v2026_v16 }
 0x6ea   : > { %v2111_v21 = vmax.f32 %v2107_v18, 0.0 }
 0x6eb   : > { %v2110_v20 = vmax.f32 %v2102_v6, 0.0 }
 0x6ec   : > { %2113 = vst [vmem:[%s403_s11 + $0x8] sm:$0xff] %v2111_v21 }
 0x6ed   : > { %2112 = vst [vmem:[%s403_s11] sm:$0xff] %v2110_v20 }
 0x6ee PF: > { %p16_p9 = scmp.ge.s32.totalorder %s2924_s13, 4   ;;  %s3566_s30 = smov %s2848_s10 }
 0x6ef   : > { %s3567_s10 = smov %s2933_s16  ;;  %s3568_s11 = smov %s2924_s13 }
 0x6f0   :  { %18 = sbr.rel (!%p16_p9) target bundleno = 2 (0x2), region = 141 }

</bundles_post_ra>
